<compile_context>
chip_gen: v7x
topology: tpu7x:2x2x1
jax: 0.10.0
libtpu: 0.0.40
codegen_flags: <defaults>
</compile_context>

<pallas_src>
import functools

import jax
import jax.numpy as jnp
from jax.experimental import pallas as pl
from jax.experimental.pallas import tpu as pltpu


# ----------------------------------------------------------------------------
# Config (small, synthetic BERT)
# ----------------------------------------------------------------------------
class Cfg:
    vocab_size = 100
    type_vocab_size = 2
    max_position = 32
    hidden = 32
    num_layers = 2
    num_heads = 2
    head_dim = 16          # hidden // num_heads
    intermediate = 64
    ln_eps = 1e-12


# ----------------------------------------------------------------------------
# Fused Pallas kernel: embeddings + all encoder layers + pooler
# ----------------------------------------------------------------------------
def _bert_fused_kernel(
    # embedding inputs
    word_ref, pos_ref, typ_ref, mask_ref, emb_g_ref, emb_b_ref,
    # stacked per-layer weights (leading dim = layer)
    qkv_w_ref, qkv_b_ref, ao_w_ref, ao_b_ref, aln_g_ref, aln_b_ref,
    i_w_ref, i_b_ref, o_w_ref, o_b_ref, oln_g_ref, oln_b_ref,
    # pooler
    pool_w_ref, pool_b_ref,
    # outputs
    hidden_out_ref, pooled_out_ref,
    *, num_layers, batch, seq, hidden, num_heads, head_dim, eps, scale):

    def layer_norm(x, g, b):
        # stats in f32
        mu = jnp.mean(x, axis=-1, keepdims=True)
        var = jnp.mean((x - mu) ** 2, axis=-1, keepdims=True)
        return (x - mu) * jax.lax.rsqrt(var + eps) * g + b

    # ---- embeddings: word + pos + type fused with LN, all in VMEM ----
    pos_typ = pos_ref[...] + typ_ref[...]                     # (S, H)
    emb = word_ref[...] + jnp.tile(pos_typ, (batch, 1))       # (B*S, H)
    h = layer_norm(emb, emb_g_ref[...], emb_b_ref[...])       # (B*S, H)

    # ---- encoder layers (static unroll; hidden state never leaves VMEM) ----
    for l in range(num_layers):
        # fused Q/K/V projection: one (H, 3H) matmul
        qkv = jnp.dot(h, qkv_w_ref[l],
                      preferred_element_type=jnp.float32) + qkv_b_ref[l]   # (B*S, 3H)
        q = qkv[:, 0 * hidden:1 * hidden]
        k = qkv[:, 1 * hidden:2 * hidden]
        v = qkv[:, 2 * hidden:3 * hidden]

        # attention with in-kernel head split/merge (static slices of VMEM values)
        ctx_rows = []
        for b in range(batch):
            r0 = b * seq
            mask_b = mask_ref[b]                               # (1, S) additive
            head_outs = []
            for hh in range(num_heads):
                c0 = hh * head_dim
                qb = q[r0:r0 + seq, c0:c0 + head_dim]          # (S, D)
                kb = k[r0:r0 + seq, c0:c0 + head_dim]
                vb = v[r0:r0 + seq, c0:c0 + head_dim]
                # contract last axes directly (no explicit transpose of K)
                s = jax.lax.dot_general(
                    qb, kb, (((1,), (1,)), ((), ())),
                    preferred_element_type=jnp.float32)        # (S, S)
                s = s * scale + mask_b                         # mask applied in f32
                s = s - jnp.max(s, axis=-1, keepdims=True)
                p = jnp.exp(s)
                p = p * pl.reciprocal(jnp.sum(p, axis=-1, keepdims=True),
                                      approx=True)
                head_outs.append(
                    jnp.dot(p, vb, preferred_element_type=jnp.float32))    # (S, D)
            ctx_rows.append(jnp.concatenate(head_outs, axis=1))            # (S, H)
        ctx = jnp.concatenate(ctx_rows, axis=0)                            # (B*S, H)

        # attention output projection + residual + LN (fused)
        attn_out = jnp.dot(ctx, ao_w_ref[l],
                           preferred_element_type=jnp.float32) + ao_b_ref[l]
        h = layer_norm(attn_out + h, aln_g_ref[l], aln_b_ref[l])

        # FFN + residual + LN (fused)
        inter = jnp.dot(h, i_w_ref[l],
                        preferred_element_type=jnp.float32) + i_b_ref[l]
        # TODO(synk): HF BERT default is exact (erf) GELU; tanh approximation used here.
        inter = jax.nn.gelu(inter, approximate=True)
        ffn = jnp.dot(inter, o_w_ref[l],
                      preferred_element_type=jnp.float32) + o_b_ref[l]
        h = layer_norm(ffn + h, oln_g_ref[l], oln_b_ref[l])

    hidden_out_ref[...] = h

    # ---- pooler: tanh(Linear(hidden[:, 0, :])) on the CLS rows ----
    cls = jnp.concatenate([h[b * seq:b * seq + 1, :] for b in range(batch)],
                          axis=0)                                          # (B, H)
    pooled = jnp.tanh(
        jnp.dot(cls, pool_w_ref[...],
                preferred_element_type=jnp.float32) + pool_b_ref[...])
    pooled_out_ref[...] = pooled


# ----------------------------------------------------------------------------
# Parameter init (deterministic, synthetic; fused QKV, stacked per-layer)
# ----------------------------------------------------------------------------
def init_params(key, cfg=Cfg):
    keys = iter(jax.random.split(key, 64))

    def nrm(shape):
        return 0.02 * jax.random.normal(next(keys), shape, jnp.float32)

    H, I, L = cfg.hidden, cfg.intermediate, cfg.num_layers
    params = {
        "word_emb": nrm((cfg.vocab_size, H)),
        "pos_emb": nrm((cfg.max_position, H)),
        "type_emb": nrm((cfg.type_vocab_size, H)),
        "emb_ln_g": jnp.ones((1, H), jnp.float32),
        "emb_ln_b": jnp.zeros((1, H), jnp.float32),
        # per-layer weights stacked on a leading layer axis
        "qkv_w": nrm((L, H, 3 * H)), "qkv_b": jnp.zeros((L, 1, 3 * H), jnp.float32),
        "ao_w": nrm((L, H, H)),      "ao_b": jnp.zeros((L, 1, H), jnp.float32),
        "aln_g": jnp.ones((L, 1, H), jnp.float32),
        "aln_b": jnp.zeros((L, 1, H), jnp.float32),
        "i_w": nrm((L, H, I)),       "i_b": jnp.zeros((L, 1, I), jnp.float32),
        "o_w": nrm((L, I, H)),       "o_b": jnp.zeros((L, 1, H), jnp.float32),
        "oln_g": jnp.ones((L, 1, H), jnp.float32),
        "oln_b": jnp.zeros((L, 1, H), jnp.float32),
        "pooler_w": nrm((H, H)),
        "pooler_b": jnp.zeros((1, H), jnp.float32),
    }
    return params


# ----------------------------------------------------------------------------
# Forward pass (== DummyModule.forward -> BertModel(input_ids, attention_mask))
# ----------------------------------------------------------------------------
def bert_forward(params, input_ids, attention_masks, cfg=Cfg):
    B, S = input_ids.shape
    H, NH, D = cfg.hidden, cfg.num_heads, cfg.head_dim
    I, L = cfg.intermediate, cfg.num_layers

    # TODO(synk): embedding table gather kept in plain JAX (data-dependent lookup).
    word = jnp.take(params["word_emb"], input_ids.reshape(-1), axis=0)     # (B*S, H)
    pos = params["pos_emb"][:S]                                            # (S, H)
    typ = params["type_emb"][0:1]                                          # (1, H), token_type_ids = 0

    # additive attention mask (f32): 0 where attended, -1e9 where masked
    add_mask = ((1.0 - attention_masks.astype(jnp.float32)) * -1e9).reshape(B, 1, S)

    inputs = (
        word, pos, typ, add_mask,
        params["emb_ln_g"], params["emb_ln_b"],
        params["qkv_w"], params["qkv_b"],
        params["ao_w"], params["ao_b"], params["aln_g"], params["aln_b"],
        params["i_w"], params["i_b"], params["o_w"], params["o_b"],
        params["oln_g"], params["oln_b"],
        params["pooler_w"], params["pooler_b"],
    )

    # advisory cost estimate for XLA scheduling around the single custom call
    flops = (2 * B * S * H * 3 * H * L            # fused QKV projections
             + 2 * (2 * S * S * D) * B * NH * L   # attention score + PV matmuls
             + 2 * B * S * H * H * L              # attention output projection
             + 2 * 2 * B * S * H * I * L          # FFN (both matmuls)
             + 2 * B * H * H)                     # pooler
    transcendentals = L * B * NH * S * S + L * B * S * I + B * H + (2 * L + 1) * B * S
    bytes_accessed = sum(int(x.size) for x in inputs) * 4 + (B * S * H + B * H) * 4

    hidden2d, pooled = pl.pallas_call(
        functools.partial(
            _bert_fused_kernel,
            num_layers=L, batch=B, seq=S, hidden=H, num_heads=NH,
            head_dim=D, eps=cfg.ln_eps, scale=1.0 / (D ** 0.5)),
        out_shape=(jax.ShapeDtypeStruct((B * S, H), jnp.float32),
                   jax.ShapeDtypeStruct((B, H), jnp.float32)),
        # whole arrays resident in VMEM (total footprint << scoped VMEM on v5e/v6e/v7x)
        in_specs=[pl.BlockSpec(memory_space=pltpu.MemorySpace.VMEM)] * len(inputs),
        out_specs=(pl.BlockSpec(memory_space=pltpu.MemorySpace.VMEM),
                   pl.BlockSpec(memory_space=pltpu.MemorySpace.VMEM)),
        cost_estimate=pl.CostEstimate(flops=flops,
                                      transcendentals=transcendentals,
                                      bytes_accessed=bytes_accessed),
    )(*inputs)

    # BertModel returns (last_hidden_state, pooler_output, ...)
    return hidden2d.reshape(B, S, H), pooled


# ----------------------------------------------------------------------------
# DummyModule equivalent
# ----------------------------------------------------------------------------
def dummy_module_forward(params, input_ids, attention_masks, dummy_tensor=None):
    return bert_forward(params, input_ids, attention_masks)


if __name__ == "__main__":
    key = jax.random.PRNGKey(0)
    k_params, k_ids = jax.random.split(key)

    B, S = 2, 8
    params = init_params(k_params)

    input_ids = jax.random.randint(k_ids, (B, S), 0, Cfg.vocab_size, dtype=jnp.int32)
    attention_masks = jnp.array(
        [[1, 1, 1, 1, 1, 1, 1, 1],
         [1, 1, 1, 1, 1, 1, 0, 0]], dtype=jnp.int32)

    fwd = jax.jit(dummy_module_forward)
    last_hidden, pooled = fwd(params, input_ids, attention_masks)
    jax.block_until_ready((last_hidden, pooled))

    assert last_hidden.shape == (B, S, Cfg.hidden)
    assert pooled.shape == (B, Cfg.hidden)
    assert bool(jnp.all(jnp.isfinite(last_hidden))) and bool(jnp.all(jnp.isfinite(pooled)))
    print("KERNEL_OK")
</pallas_src>

<mosaic_0001>
module attributes {stable_mosaic.version = 11 : i64} {
  func.func @_bert_fused_kernel(%arg0: memref<16x32xf32, #tpu.memory_space<vmem>>, %arg1: memref<8x32xf32, #tpu.memory_space<vmem>>, %arg2: memref<1x32xf32, #tpu.memory_space<vmem>>, %arg3: memref<2x1x8xf32, #tpu.memory_space<vmem>>, %arg4: memref<1x32xf32, #tpu.memory_space<vmem>>, %arg5: memref<1x32xf32, #tpu.memory_space<vmem>>, %arg6: memref<2x32x96xf32, #tpu.memory_space<vmem>>, %arg7: memref<2x1x96xf32, #tpu.memory_space<vmem>>, %arg8: memref<2x32x32xf32, #tpu.memory_space<vmem>>, %arg9: memref<2x1x32xf32, #tpu.memory_space<vmem>>, %arg10: memref<2x1x32xf32, #tpu.memory_space<vmem>>, %arg11: memref<2x1x32xf32, #tpu.memory_space<vmem>>, %arg12: memref<2x32x64xf32, #tpu.memory_space<vmem>>, %arg13: memref<2x1x64xf32, #tpu.memory_space<vmem>>, %arg14: memref<2x64x32xf32, #tpu.memory_space<vmem>>, %arg15: memref<2x1x32xf32, #tpu.memory_space<vmem>>, %arg16: memref<2x1x32xf32, #tpu.memory_space<vmem>>, %arg17: memref<2x1x32xf32, #tpu.memory_space<vmem>>, %arg18: memref<32x32xf32, #tpu.memory_space<vmem>>, %arg19: memref<1x32xf32, #tpu.memory_space<vmem>>, %arg20: memref<16x32xf32, #tpu.memory_space<vmem>>, %arg21: memref<2x32xf32, #tpu.memory_space<vmem>>) attributes {dimension_semantics = [], scalar_prefetch = 0 : i64, scratch_operands = 0 : i64, tpu.core_type = #tpu.core_type<tc>} {
    %c0 = arith.constant 0 : index
    %c0_0 = arith.constant 0 : index
    %0 = vector.load %arg1[%c0, %c0_0] : memref<8x32xf32, #tpu.memory_space<vmem>>, vector<8x32xf32>
    %c0_1 = arith.constant 0 : index
    %c0_2 = arith.constant 0 : index
    %1 = vector.load %arg2[%c0_1, %c0_2] : memref<1x32xf32, #tpu.memory_space<vmem>>, vector<1x32xf32>
    %2 = vector.broadcast %1 : vector<1x32xf32> to vector<8x32xf32>
    %3 = arith.addf %0, %2 : vector<8x32xf32>
    %c0_3 = arith.constant 0 : index
    %c0_4 = arith.constant 0 : index
    %4 = vector.load %arg0[%c0_3, %c0_4] : memref<16x32xf32, #tpu.memory_space<vmem>>, vector<16x32xf32>
    %5 = tpu.concatenate %3, %3 in 0 : vector<8x32xf32>, vector<8x32xf32> -> vector<16x32xf32>
    %6 = arith.addf %4, %5 : vector<16x32xf32>
    %c0_5 = arith.constant 0 : index
    %c0_6 = arith.constant 0 : index
    %7 = vector.load %arg4[%c0_5, %c0_6] : memref<1x32xf32, #tpu.memory_space<vmem>>, vector<1x32xf32>
    %c0_7 = arith.constant 0 : index
    %c0_8 = arith.constant 0 : index
    %8 = vector.load %arg5[%c0_7, %c0_8] : memref<1x32xf32, #tpu.memory_space<vmem>>, vector<1x32xf32>
    %cst = arith.constant dense<0.000000e+00> : vector<16xf32>
    %9 = vector.multi_reduction <add>, %6, %cst [1] : vector<16x32xf32> to vector<16xf32>
    %10 = vector.shape_cast %9 : vector<16xf32> to vector<16x1xf32>
    %cst_9 = arith.constant 3.200000e+01 : f32
    %11 = vector.broadcast %cst_9 : f32 to vector<16x1xf32>
    %12 = arith.divf %10, %11 : vector<16x1xf32>
    %13 = vector.broadcast %12 : vector<16x1xf32> to vector<16x32xf32>
    %14 = arith.subf %6, %13 : vector<16x32xf32>
    %15 = arith.mulf %14, %14 : vector<16x32xf32>
    %cst_10 = arith.constant dense<0.000000e+00> : vector<16xf32>
    %16 = vector.multi_reduction <add>, %15, %cst_10 [1] : vector<16x32xf32> to vector<16xf32>
    %17 = vector.shape_cast %16 : vector<16xf32> to vector<16x1xf32>
    %cst_11 = arith.constant 3.200000e+01 : f32
    %18 = vector.broadcast %cst_11 : f32 to vector<16x1xf32>
    %19 = arith.divf %17, %18 : vector<16x1xf32>
    %20 = vector.broadcast %12 : vector<16x1xf32> to vector<16x32xf32>
    %21 = arith.subf %6, %20 : vector<16x32xf32>
    %cst_12 = arith.constant 9.99999996E-13 : f32
    %22 = vector.broadcast %cst_12 : f32 to vector<16x1xf32>
    %23 = arith.addf %19, %22 : vector<16x1xf32>
    %24 = math.rsqrt %23 : vector<16x1xf32>
    %25 = vector.broadcast %24 : vector<16x1xf32> to vector<16x32xf32>
    %26 = arith.mulf %21, %25 : vector<16x32xf32>
    %27 = vector.broadcast %7 : vector<1x32xf32> to vector<16x32xf32>
    %28 = arith.mulf %26, %27 : vector<16x32xf32>
    %29 = vector.broadcast %8 : vector<1x32xf32> to vector<16x32xf32>
    %30 = arith.addf %28, %29 : vector<16x32xf32>
    %c0_13 = arith.constant 0 : index
    %c0_14 = arith.constant 0 : index
    %c0_15 = arith.constant 0 : index
    %31 = vector.load %arg6[%c0_13, %c0_14, %c0_15] : memref<2x32x96xf32, #tpu.memory_space<vmem>>, vector<1x32x96xf32>
    %32 = vector.shape_cast %31 : vector<1x32x96xf32> to vector<32x96xf32>
    %cst_16 = arith.constant dense<0.000000e+00> : vector<16x96xf32>
    %33 = tpu.matmul %30, %32, %cst_16 {dimension_numbers = #tpu.dot_dimension_numbers<[1], [0], [0], [1], [0, 0, 1, 1], [], []>} : vector<16x32xf32>, vector<32x96xf32>, vector<16x96xf32> -> vector<16x96xf32>
    %c0_17 = arith.constant 0 : index
    %c0_18 = arith.constant 0 : index
    %c0_19 = arith.constant 0 : index
    %34 = vector.load %arg7[%c0_17, %c0_18, %c0_19] : memref<2x1x96xf32, #tpu.memory_space<vmem>>, vector<1x1x96xf32>
    %35 = vector.shape_cast %34 : vector<1x1x96xf32> to vector<1x96xf32>
    %36 = vector.broadcast %35 : vector<1x96xf32> to vector<16x96xf32>
    %37 = arith.addf %33, %36 : vector<16x96xf32>
    %38 = vector.extract_strided_slice %37 {offsets = [0, 0], sizes = [16, 32], strides = [1, 1]} : vector<16x96xf32> to vector<16x32xf32>
    %39 = vector.extract_strided_slice %37 {offsets = [0, 32], sizes = [16, 32], strides = [1, 1]} : vector<16x96xf32> to vector<16x32xf32>
    %40 = vector.extract_strided_slice %37 {offsets = [0, 64], sizes = [16, 32], strides = [1, 1]} : vector<16x96xf32> to vector<16x32xf32>
    %c0_20 = arith.constant 0 : index
    %c0_21 = arith.constant 0 : index
    %c0_22 = arith.constant 0 : index
    %41 = vector.load %arg3[%c0_20, %c0_21, %c0_22] : memref<2x1x8xf32, #tpu.memory_space<vmem>>, vector<1x1x8xf32>
    %42 = vector.shape_cast %41 : vector<1x1x8xf32> to vector<1x8xf32>
    %43 = vector.extract_strided_slice %38 {offsets = [0, 0], sizes = [8, 16], strides = [1, 1]} : vector<16x32xf32> to vector<8x16xf32>
    %44 = vector.extract_strided_slice %39 {offsets = [0, 0], sizes = [8, 16], strides = [1, 1]} : vector<16x32xf32> to vector<8x16xf32>
    %45 = vector.extract_strided_slice %40 {offsets = [0, 0], sizes = [8, 16], strides = [1, 1]} : vector<16x32xf32> to vector<8x16xf32>
    %cst_23 = arith.constant dense<0.000000e+00> : vector<8x8xf32>
    %46 = tpu.matmul %43, %44, %cst_23 {dimension_numbers = #tpu.dot_dimension_numbers<[1], [1], [0], [0], [0, 0, 1, 0], [], []>} : vector<8x16xf32>, vector<8x16xf32>, vector<8x8xf32> -> vector<8x8xf32>
    %cst_24 = arith.constant 2.500000e-01 : f32
    %47 = vector.broadcast %cst_24 : f32 to vector<8x8xf32>
    %48 = arith.mulf %46, %47 : vector<8x8xf32>
    %49 = vector.broadcast %42 : vector<1x8xf32> to vector<8x8xf32>
    %50 = arith.addf %48, %49 : vector<8x8xf32>
    %cst_25 = arith.constant dense<0xFF800000> : vector<8xf32>
    %51 = vector.multi_reduction <maximumf>, %50, %cst_25 [1] : vector<8x8xf32> to vector<8xf32>
    %52 = vector.shape_cast %51 : vector<8xf32> to vector<8x1xf32>
    %53 = vector.broadcast %52 : vector<8x1xf32> to vector<8x8xf32>
    %54 = arith.subf %50, %53 : vector<8x8xf32>
    %55 = math.exp %54 : vector<8x8xf32>
    %cst_26 = arith.constant dense<0.000000e+00> : vector<8xf32>
    %56 = vector.multi_reduction <add>, %55, %cst_26 [1] : vector<8x8xf32> to vector<8xf32>
    %57 = vector.shape_cast %56 : vector<8xf32> to vector<8x1xf32>
    %58 = tpu.reciprocal %57 {approx = true} : vector<8x1xf32> -> vector<8x1xf32>
    %59 = vector.broadcast %58 : vector<8x1xf32> to vector<8x8xf32>
    %60 = arith.mulf %55, %59 : vector<8x8xf32>
    %cst_27 = arith.constant dense<0.000000e+00> : vector<8x16xf32>
    %61 = tpu.matmul %60, %45, %cst_27 {dimension_numbers = #tpu.dot_dimension_numbers<[1], [0], [0], [1], [0, 0, 1, 1], [], []>} : vector<8x8xf32>, vector<8x16xf32>, vector<8x16xf32> -> vector<8x16xf32>
    %62 = vector.extract_strided_slice %38 {offsets = [0, 16], sizes = [8, 16], strides = [1, 1]} : vector<16x32xf32> to vector<8x16xf32>
    %63 = vector.extract_strided_slice %39 {offsets = [0, 16], sizes = [8, 16], strides = [1, 1]} : vector<16x32xf32> to vector<8x16xf32>
    %64 = vector.extract_strided_slice %40 {offsets = [0, 16], sizes = [8, 16], strides = [1, 1]} : vector<16x32xf32> to vector<8x16xf32>
    %cst_28 = arith.constant dense<0.000000e+00> : vector<8x8xf32>
    %65 = tpu.matmul %62, %63, %cst_28 {dimension_numbers = #tpu.dot_dimension_numbers<[1], [1], [0], [0], [0, 0, 1, 0], [], []>} : vector<8x16xf32>, vector<8x16xf32>, vector<8x8xf32> -> vector<8x8xf32>
    %cst_29 = arith.constant 2.500000e-01 : f32
    %66 = vector.broadcast %cst_29 : f32 to vector<8x8xf32>
    %67 = arith.mulf %65, %66 : vector<8x8xf32>
    %68 = vector.broadcast %42 : vector<1x8xf32> to vector<8x8xf32>
    %69 = arith.addf %67, %68 : vector<8x8xf32>
    %cst_30 = arith.constant dense<0xFF800000> : vector<8xf32>
    %70 = vector.multi_reduction <maximumf>, %69, %cst_30 [1] : vector<8x8xf32> to vector<8xf32>
    %71 = vector.shape_cast %70 : vector<8xf32> to vector<8x1xf32>
    %72 = vector.broadcast %71 : vector<8x1xf32> to vector<8x8xf32>
    %73 = arith.subf %69, %72 : vector<8x8xf32>
    %74 = math.exp %73 : vector<8x8xf32>
    %cst_31 = arith.constant dense<0.000000e+00> : vector<8xf32>
    %75 = vector.multi_reduction <add>, %74, %cst_31 [1] : vector<8x8xf32> to vector<8xf32>
    %76 = vector.shape_cast %75 : vector<8xf32> to vector<8x1xf32>
    %77 = tpu.reciprocal %76 {approx = true} : vector<8x1xf32> -> vector<8x1xf32>
    %78 = vector.broadcast %77 : vector<8x1xf32> to vector<8x8xf32>
    %79 = arith.mulf %74, %78 : vector<8x8xf32>
    %cst_32 = arith.constant dense<0.000000e+00> : vector<8x16xf32>
    %80 = tpu.matmul %79, %64, %cst_32 {dimension_numbers = #tpu.dot_dimension_numbers<[1], [0], [0], [1], [0, 0, 1, 1], [], []>} : vector<8x8xf32>, vector<8x16xf32>, vector<8x16xf32> -> vector<8x16xf32>
    %81 = tpu.concatenate %61, %80 in 1 : vector<8x16xf32>, vector<8x16xf32> -> vector<8x32xf32>
    %c1 = arith.constant 1 : index
    %c0_33 = arith.constant 0 : index
    %c0_34 = arith.constant 0 : index
    %82 = vector.load %arg3[%c1, %c0_33, %c0_34] : memref<2x1x8xf32, #tpu.memory_space<vmem>>, vector<1x1x8xf32>
    %83 = vector.shape_cast %82 : vector<1x1x8xf32> to vector<1x8xf32>
    %84 = vector.extract_strided_slice %38 {offsets = [8, 0], sizes = [8, 16], strides = [1, 1]} : vector<16x32xf32> to vector<8x16xf32>
    %85 = vector.extract_strided_slice %39 {offsets = [8, 0], sizes = [8, 16], strides = [1, 1]} : vector<16x32xf32> to vector<8x16xf32>
    %86 = vector.extract_strided_slice %40 {offsets = [8, 0], sizes = [8, 16], strides = [1, 1]} : vector<16x32xf32> to vector<8x16xf32>
    %cst_35 = arith.constant dense<0.000000e+00> : vector<8x8xf32>
    %87 = tpu.matmul %84, %85, %cst_35 {dimension_numbers = #tpu.dot_dimension_numbers<[1], [1], [0], [0], [0, 0, 1, 0], [], []>} : vector<8x16xf32>, vector<8x16xf32>, vector<8x8xf32> -> vector<8x8xf32>
    %cst_36 = arith.constant 2.500000e-01 : f32
    %88 = vector.broadcast %cst_36 : f32 to vector<8x8xf32>
    %89 = arith.mulf %87, %88 : vector<8x8xf32>
    %90 = vector.broadcast %83 : vector<1x8xf32> to vector<8x8xf32>
    %91 = arith.addf %89, %90 : vector<8x8xf32>
    %cst_37 = arith.constant dense<0xFF800000> : vector<8xf32>
    %92 = vector.multi_reduction <maximumf>, %91, %cst_37 [1] : vector<8x8xf32> to vector<8xf32>
    %93 = vector.shape_cast %92 : vector<8xf32> to vector<8x1xf32>
    %94 = vector.broadcast %93 : vector<8x1xf32> to vector<8x8xf32>
    %95 = arith.subf %91, %94 : vector<8x8xf32>
    %96 = math.exp %95 : vector<8x8xf32>
    %cst_38 = arith.constant dense<0.000000e+00> : vector<8xf32>
    %97 = vector.multi_reduction <add>, %96, %cst_38 [1] : vector<8x8xf32> to vector<8xf32>
    %98 = vector.shape_cast %97 : vector<8xf32> to vector<8x1xf32>
    %99 = tpu.reciprocal %98 {approx = true} : vector<8x1xf32> -> vector<8x1xf32>
    %100 = vector.broadcast %99 : vector<8x1xf32> to vector<8x8xf32>
    %101 = arith.mulf %96, %100 : vector<8x8xf32>
    %cst_39 = arith.constant dense<0.000000e+00> : vector<8x16xf32>
    %102 = tpu.matmul %101, %86, %cst_39 {dimension_numbers = #tpu.dot_dimension_numbers<[1], [0], [0], [1], [0, 0, 1, 1], [], []>} : vector<8x8xf32>, vector<8x16xf32>, vector<8x16xf32> -> vector<8x16xf32>
    %103 = vector.extract_strided_slice %38 {offsets = [8, 16], sizes = [8, 16], strides = [1, 1]} : vector<16x32xf32> to vector<8x16xf32>
    %104 = vector.extract_strided_slice %39 {offsets = [8, 16], sizes = [8, 16], strides = [1, 1]} : vector<16x32xf32> to vector<8x16xf32>
    %105 = vector.extract_strided_slice %40 {offsets = [8, 16], sizes = [8, 16], strides = [1, 1]} : vector<16x32xf32> to vector<8x16xf32>
    %cst_40 = arith.constant dense<0.000000e+00> : vector<8x8xf32>
    %106 = tpu.matmul %103, %104, %cst_40 {dimension_numbers = #tpu.dot_dimension_numbers<[1], [1], [0], [0], [0, 0, 1, 0], [], []>} : vector<8x16xf32>, vector<8x16xf32>, vector<8x8xf32> -> vector<8x8xf32>
    %cst_41 = arith.constant 2.500000e-01 : f32
    %107 = vector.broadcast %cst_41 : f32 to vector<8x8xf32>
    %108 = arith.mulf %106, %107 : vector<8x8xf32>
    %109 = vector.broadcast %83 : vector<1x8xf32> to vector<8x8xf32>
    %110 = arith.addf %108, %109 : vector<8x8xf32>
    %cst_42 = arith.constant dense<0xFF800000> : vector<8xf32>
    %111 = vector.multi_reduction <maximumf>, %110, %cst_42 [1] : vector<8x8xf32> to vector<8xf32>
    %112 = vector.shape_cast %111 : vector<8xf32> to vector<8x1xf32>
    %113 = vector.broadcast %112 : vector<8x1xf32> to vector<8x8xf32>
    %114 = arith.subf %110, %113 : vector<8x8xf32>
    %115 = math.exp %114 : vector<8x8xf32>
    %cst_43 = arith.constant dense<0.000000e+00> : vector<8xf32>
    %116 = vector.multi_reduction <add>, %115, %cst_43 [1] : vector<8x8xf32> to vector<8xf32>
    %117 = vector.shape_cast %116 : vector<8xf32> to vector<8x1xf32>
    %118 = tpu.reciprocal %117 {approx = true} : vector<8x1xf32> -> vector<8x1xf32>
    %119 = vector.broadcast %118 : vector<8x1xf32> to vector<8x8xf32>
    %120 = arith.mulf %115, %119 : vector<8x8xf32>
    %cst_44 = arith.constant dense<0.000000e+00> : vector<8x16xf32>
    %121 = tpu.matmul %120, %105, %cst_44 {dimension_numbers = #tpu.dot_dimension_numbers<[1], [0], [0], [1], [0, 0, 1, 1], [], []>} : vector<8x8xf32>, vector<8x16xf32>, vector<8x16xf32> -> vector<8x16xf32>
    %122 = tpu.concatenate %102, %121 in 1 : vector<8x16xf32>, vector<8x16xf32> -> vector<8x32xf32>
    %123 = tpu.concatenate %81, %122 in 0 : vector<8x32xf32>, vector<8x32xf32> -> vector<16x32xf32>
    %c0_45 = arith.constant 0 : index
    %c0_46 = arith.constant 0 : index
    %c0_47 = arith.constant 0 : index
    %124 = vector.load %arg8[%c0_45, %c0_46, %c0_47] : memref<2x32x32xf32, #tpu.memory_space<vmem>>, vector<1x32x32xf32>
    %125 = vector.shape_cast %124 : vector<1x32x32xf32> to vector<32x32xf32>
    %cst_48 = arith.constant dense<0.000000e+00> : vector<16x32xf32>
    %126 = tpu.matmul %123, %125, %cst_48 {dimension_numbers = #tpu.dot_dimension_numbers<[1], [0], [0], [1], [0, 0, 1, 1], [], []>} : vector<16x32xf32>, vector<32x32xf32>, vector<16x32xf32> -> vector<16x32xf32>
    %c0_49 = arith.constant 0 : index
    %c0_50 = arith.constant 0 : index
    %c0_51 = arith.constant 0 : index
    %127 = vector.load %arg9[%c0_49, %c0_50, %c0_51] : memref<2x1x32xf32, #tpu.memory_space<vmem>>, vector<1x1x32xf32>
    %128 = vector.shape_cast %127 : vector<1x1x32xf32> to vector<1x32xf32>
    %129 = vector.broadcast %128 : vector<1x32xf32> to vector<16x32xf32>
    %130 = arith.addf %126, %129 : vector<16x32xf32>
    %131 = arith.addf %130, %30 : vector<16x32xf32>
    %c0_52 = arith.constant 0 : index
    %c0_53 = arith.constant 0 : index
    %c0_54 = arith.constant 0 : index
    %132 = vector.load %arg10[%c0_52, %c0_53, %c0_54] : memref<2x1x32xf32, #tpu.memory_space<vmem>>, vector<1x1x32xf32>
    %133 = vector.shape_cast %132 : vector<1x1x32xf32> to vector<1x32xf32>
    %c0_55 = arith.constant 0 : index
    %c0_56 = arith.constant 0 : index
    %c0_57 = arith.constant 0 : index
    %134 = vector.load %arg11[%c0_55, %c0_56, %c0_57] : memref<2x1x32xf32, #tpu.memory_space<vmem>>, vector<1x1x32xf32>
    %135 = vector.shape_cast %134 : vector<1x1x32xf32> to vector<1x32xf32>
    %cst_58 = arith.constant dense<0.000000e+00> : vector<16xf32>
    %136 = vector.multi_reduction <add>, %131, %cst_58 [1] : vector<16x32xf32> to vector<16xf32>
    %137 = vector.shape_cast %136 : vector<16xf32> to vector<16x1xf32>
    %cst_59 = arith.constant 3.200000e+01 : f32
    %138 = vector.broadcast %cst_59 : f32 to vector<16x1xf32>
    %139 = arith.divf %137, %138 : vector<16x1xf32>
    %140 = vector.broadcast %139 : vector<16x1xf32> to vector<16x32xf32>
    %141 = arith.subf %131, %140 : vector<16x32xf32>
    %142 = arith.mulf %141, %141 : vector<16x32xf32>
    %cst_60 = arith.constant dense<0.000000e+00> : vector<16xf32>
    %143 = vector.multi_reduction <add>, %142, %cst_60 [1] : vector<16x32xf32> to vector<16xf32>
    %144 = vector.shape_cast %143 : vector<16xf32> to vector<16x1xf32>
    %cst_61 = arith.constant 3.200000e+01 : f32
    %145 = vector.broadcast %cst_61 : f32 to vector<16x1xf32>
    %146 = arith.divf %144, %145 : vector<16x1xf32>
    %147 = vector.broadcast %139 : vector<16x1xf32> to vector<16x32xf32>
    %148 = arith.subf %131, %147 : vector<16x32xf32>
    %cst_62 = arith.constant 9.99999996E-13 : f32
    %149 = vector.broadcast %cst_62 : f32 to vector<16x1xf32>
    %150 = arith.addf %146, %149 : vector<16x1xf32>
    %151 = math.rsqrt %150 : vector<16x1xf32>
    %152 = vector.broadcast %151 : vector<16x1xf32> to vector<16x32xf32>
    %153 = arith.mulf %148, %152 : vector<16x32xf32>
    %154 = vector.broadcast %133 : vector<1x32xf32> to vector<16x32xf32>
    %155 = arith.mulf %153, %154 : vector<16x32xf32>
    %156 = vector.broadcast %135 : vector<1x32xf32> to vector<16x32xf32>
    %157 = arith.addf %155, %156 : vector<16x32xf32>
    %c0_63 = arith.constant 0 : index
    %c0_64 = arith.constant 0 : index
    %c0_65 = arith.constant 0 : index
    %158 = vector.load %arg12[%c0_63, %c0_64, %c0_65] : memref<2x32x64xf32, #tpu.memory_space<vmem>>, vector<1x32x64xf32>
    %159 = vector.shape_cast %158 : vector<1x32x64xf32> to vector<32x64xf32>
    %cst_66 = arith.constant dense<0.000000e+00> : vector<16x64xf32>
    %160 = tpu.matmul %157, %159, %cst_66 {dimension_numbers = #tpu.dot_dimension_numbers<[1], [0], [0], [1], [0, 0, 1, 1], [], []>} : vector<16x32xf32>, vector<32x64xf32>, vector<16x64xf32> -> vector<16x64xf32>
    %c0_67 = arith.constant 0 : index
    %c0_68 = arith.constant 0 : index
    %c0_69 = arith.constant 0 : index
    %161 = vector.load %arg13[%c0_67, %c0_68, %c0_69] : memref<2x1x64xf32, #tpu.memory_space<vmem>>, vector<1x1x64xf32>
    %162 = vector.shape_cast %161 : vector<1x1x64xf32> to vector<1x64xf32>
    %163 = vector.broadcast %162 : vector<1x64xf32> to vector<16x64xf32>
    %164 = arith.addf %160, %163 : vector<16x64xf32>
    %165 = arith.mulf %164, %164 : vector<16x64xf32>
    %166 = arith.mulf %164, %165 : vector<16x64xf32>
    %cst_70 = arith.constant 4.471500e-02 : f32
    %167 = vector.broadcast %cst_70 : f32 to vector<16x64xf32>
    %168 = arith.mulf %167, %166 : vector<16x64xf32>
    %169 = arith.addf %164, %168 : vector<16x64xf32>
    %cst_71 = arith.constant 0.797884583 : f32
    %170 = vector.broadcast %cst_71 : f32 to vector<16x64xf32>
    %171 = arith.mulf %170, %169 : vector<16x64xf32>
    %172 = math.tanh %171 : vector<16x64xf32>
    %cst_72 = arith.constant 1.000000e+00 : f32
    %173 = vector.broadcast %cst_72 : f32 to vector<16x64xf32>
    %174 = arith.addf %173, %172 : vector<16x64xf32>
    %cst_73 = arith.constant 5.000000e-01 : f32
    %175 = vector.broadcast %cst_73 : f32 to vector<16x64xf32>
    %176 = arith.mulf %175, %174 : vector<16x64xf32>
    %177 = arith.mulf %164, %176 : vector<16x64xf32>
    %c0_74 = arith.constant 0 : index
    %c0_75 = arith.constant 0 : index
    %c0_76 = arith.constant 0 : index
    %178 = vector.load %arg14[%c0_74, %c0_75, %c0_76] : memref<2x64x32xf32, #tpu.memory_space<vmem>>, vector<1x64x32xf32>
    %179 = vector.shape_cast %178 : vector<1x64x32xf32> to vector<64x32xf32>
    %cst_77 = arith.constant dense<0.000000e+00> : vector<16x32xf32>
    %180 = tpu.matmul %177, %179, %cst_77 {dimension_numbers = #tpu.dot_dimension_numbers<[1], [0], [0], [1], [0, 0, 1, 1], [], []>} : vector<16x64xf32>, vector<64x32xf32>, vector<16x32xf32> -> vector<16x32xf32>
    %c0_78 = arith.constant 0 : index
    %c0_79 = arith.constant 0 : index
    %c0_80 = arith.constant 0 : index
    %181 = vector.load %arg15[%c0_78, %c0_79, %c0_80] : memref<2x1x32xf32, #tpu.memory_space<vmem>>, vector<1x1x32xf32>
    %182 = vector.shape_cast %181 : vector<1x1x32xf32> to vector<1x32xf32>
    %183 = vector.broadcast %182 : vector<1x32xf32> to vector<16x32xf32>
    %184 = arith.addf %180, %183 : vector<16x32xf32>
    %185 = arith.addf %184, %157 : vector<16x32xf32>
    %c0_81 = arith.constant 0 : index
    %c0_82 = arith.constant 0 : index
    %c0_83 = arith.constant 0 : index
    %186 = vector.load %arg16[%c0_81, %c0_82, %c0_83] : memref<2x1x32xf32, #tpu.memory_space<vmem>>, vector<1x1x32xf32>
    %187 = vector.shape_cast %186 : vector<1x1x32xf32> to vector<1x32xf32>
    %c0_84 = arith.constant 0 : index
    %c0_85 = arith.constant 0 : index
    %c0_86 = arith.constant 0 : index
    %188 = vector.load %arg17[%c0_84, %c0_85, %c0_86] : memref<2x1x32xf32, #tpu.memory_space<vmem>>, vector<1x1x32xf32>
    %189 = vector.shape_cast %188 : vector<1x1x32xf32> to vector<1x32xf32>
    %cst_87 = arith.constant dense<0.000000e+00> : vector<16xf32>
    %190 = vector.multi_reduction <add>, %185, %cst_87 [1] : vector<16x32xf32> to vector<16xf32>
    %191 = vector.shape_cast %190 : vector<16xf32> to vector<16x1xf32>
    %cst_88 = arith.constant 3.200000e+01 : f32
    %192 = vector.broadcast %cst_88 : f32 to vector<16x1xf32>
    %193 = arith.divf %191, %192 : vector<16x1xf32>
    %194 = vector.broadcast %193 : vector<16x1xf32> to vector<16x32xf32>
    %195 = arith.subf %185, %194 : vector<16x32xf32>
    %196 = arith.mulf %195, %195 : vector<16x32xf32>
    %cst_89 = arith.constant dense<0.000000e+00> : vector<16xf32>
    %197 = vector.multi_reduction <add>, %196, %cst_89 [1] : vector<16x32xf32> to vector<16xf32>
    %198 = vector.shape_cast %197 : vector<16xf32> to vector<16x1xf32>
    %cst_90 = arith.constant 3.200000e+01 : f32
    %199 = vector.broadcast %cst_90 : f32 to vector<16x1xf32>
    %200 = arith.divf %198, %199 : vector<16x1xf32>
    %201 = vector.broadcast %193 : vector<16x1xf32> to vector<16x32xf32>
    %202 = arith.subf %185, %201 : vector<16x32xf32>
    %cst_91 = arith.constant 9.99999996E-13 : f32
    %203 = vector.broadcast %cst_91 : f32 to vector<16x1xf32>
    %204 = arith.addf %200, %203 : vector<16x1xf32>
    %205 = math.rsqrt %204 : vector<16x1xf32>
    %206 = vector.broadcast %205 : vector<16x1xf32> to vector<16x32xf32>
    %207 = arith.mulf %202, %206 : vector<16x32xf32>
    %208 = vector.broadcast %187 : vector<1x32xf32> to vector<16x32xf32>
    %209 = arith.mulf %207, %208 : vector<16x32xf32>
    %210 = vector.broadcast %189 : vector<1x32xf32> to vector<16x32xf32>
    %211 = arith.addf %209, %210 : vector<16x32xf32>
    %c1_92 = arith.constant 1 : index
    %c0_93 = arith.constant 0 : index
    %c0_94 = arith.constant 0 : index
    %212 = vector.load %arg6[%c1_92, %c0_93, %c0_94] : memref<2x32x96xf32, #tpu.memory_space<vmem>>, vector<1x32x96xf32>
    %213 = vector.shape_cast %212 : vector<1x32x96xf32> to vector<32x96xf32>
    %cst_95 = arith.constant dense<0.000000e+00> : vector<16x96xf32>
    %214 = tpu.matmul %211, %213, %cst_95 {dimension_numbers = #tpu.dot_dimension_numbers<[1], [0], [0], [1], [0, 0, 1, 1], [], []>} : vector<16x32xf32>, vector<32x96xf32>, vector<16x96xf32> -> vector<16x96xf32>
    %c1_96 = arith.constant 1 : index
    %c0_97 = arith.constant 0 : index
    %c0_98 = arith.constant 0 : index
    %215 = vector.load %arg7[%c1_96, %c0_97, %c0_98] : memref<2x1x96xf32, #tpu.memory_space<vmem>>, vector<1x1x96xf32>
    %216 = vector.shape_cast %215 : vector<1x1x96xf32> to vector<1x96xf32>
    %217 = vector.broadcast %216 : vector<1x96xf32> to vector<16x96xf32>
    %218 = arith.addf %214, %217 : vector<16x96xf32>
    %219 = vector.extract_strided_slice %218 {offsets = [0, 0], sizes = [16, 32], strides = [1, 1]} : vector<16x96xf32> to vector<16x32xf32>
    %220 = vector.extract_strided_slice %218 {offsets = [0, 32], sizes = [16, 32], strides = [1, 1]} : vector<16x96xf32> to vector<16x32xf32>
    %221 = vector.extract_strided_slice %218 {offsets = [0, 64], sizes = [16, 32], strides = [1, 1]} : vector<16x96xf32> to vector<16x32xf32>
    %c0_99 = arith.constant 0 : index
    %c0_100 = arith.constant 0 : index
    %c0_101 = arith.constant 0 : index
    %222 = vector.load %arg3[%c0_99, %c0_100, %c0_101] : memref<2x1x8xf32, #tpu.memory_space<vmem>>, vector<1x1x8xf32>
    %223 = vector.shape_cast %222 : vector<1x1x8xf32> to vector<1x8xf32>
    %224 = vector.extract_strided_slice %219 {offsets = [0, 0], sizes = [8, 16], strides = [1, 1]} : vector<16x32xf32> to vector<8x16xf32>
    %225 = vector.extract_strided_slice %220 {offsets = [0, 0], sizes = [8, 16], strides = [1, 1]} : vector<16x32xf32> to vector<8x16xf32>
    %226 = vector.extract_strided_slice %221 {offsets = [0, 0], sizes = [8, 16], strides = [1, 1]} : vector<16x32xf32> to vector<8x16xf32>
    %cst_102 = arith.constant dense<0.000000e+00> : vector<8x8xf32>
    %227 = tpu.matmul %224, %225, %cst_102 {dimension_numbers = #tpu.dot_dimension_numbers<[1], [1], [0], [0], [0, 0, 1, 0], [], []>} : vector<8x16xf32>, vector<8x16xf32>, vector<8x8xf32> -> vector<8x8xf32>
    %cst_103 = arith.constant 2.500000e-01 : f32
    %228 = vector.broadcast %cst_103 : f32 to vector<8x8xf32>
    %229 = arith.mulf %227, %228 : vector<8x8xf32>
    %230 = vector.broadcast %223 : vector<1x8xf32> to vector<8x8xf32>
    %231 = arith.addf %229, %230 : vector<8x8xf32>
    %cst_104 = arith.constant dense<0xFF800000> : vector<8xf32>
    %232 = vector.multi_reduction <maximumf>, %231, %cst_104 [1] : vector<8x8xf32> to vector<8xf32>
    %233 = vector.shape_cast %232 : vector<8xf32> to vector<8x1xf32>
    %234 = vector.broadcast %233 : vector<8x1xf32> to vector<8x8xf32>
    %235 = arith.subf %231, %234 : vector<8x8xf32>
    %236 = math.exp %235 : vector<8x8xf32>
    %cst_105 = arith.constant dense<0.000000e+00> : vector<8xf32>
    %237 = vector.multi_reduction <add>, %236, %cst_105 [1] : vector<8x8xf32> to vector<8xf32>
    %238 = vector.shape_cast %237 : vector<8xf32> to vector<8x1xf32>
    %239 = tpu.reciprocal %238 {approx = true} : vector<8x1xf32> -> vector<8x1xf32>
    %240 = vector.broadcast %239 : vector<8x1xf32> to vector<8x8xf32>
    %241 = arith.mulf %236, %240 : vector<8x8xf32>
    %cst_106 = arith.constant dense<0.000000e+00> : vector<8x16xf32>
    %242 = tpu.matmul %241, %226, %cst_106 {dimension_numbers = #tpu.dot_dimension_numbers<[1], [0], [0], [1], [0, 0, 1, 1], [], []>} : vector<8x8xf32>, vector<8x16xf32>, vector<8x16xf32> -> vector<8x16xf32>
    %243 = vector.extract_strided_slice %219 {offsets = [0, 16], sizes = [8, 16], strides = [1, 1]} : vector<16x32xf32> to vector<8x16xf32>
    %244 = vector.extract_strided_slice %220 {offsets = [0, 16], sizes = [8, 16], strides = [1, 1]} : vector<16x32xf32> to vector<8x16xf32>
    %245 = vector.extract_strided_slice %221 {offsets = [0, 16], sizes = [8, 16], strides = [1, 1]} : vector<16x32xf32> to vector<8x16xf32>
    %cst_107 = arith.constant dense<0.000000e+00> : vector<8x8xf32>
    %246 = tpu.matmul %243, %244, %cst_107 {dimension_numbers = #tpu.dot_dimension_numbers<[1], [1], [0], [0], [0, 0, 1, 0], [], []>} : vector<8x16xf32>, vector<8x16xf32>, vector<8x8xf32> -> vector<8x8xf32>
    %cst_108 = arith.constant 2.500000e-01 : f32
    %247 = vector.broadcast %cst_108 : f32 to vector<8x8xf32>
    %248 = arith.mulf %246, %247 : vector<8x8xf32>
    %249 = vector.broadcast %223 : vector<1x8xf32> to vector<8x8xf32>
    %250 = arith.addf %248, %249 : vector<8x8xf32>
    %cst_109 = arith.constant dense<0xFF800000> : vector<8xf32>
    %251 = vector.multi_reduction <maximumf>, %250, %cst_109 [1] : vector<8x8xf32> to vector<8xf32>
    %252 = vector.shape_cast %251 : vector<8xf32> to vector<8x1xf32>
    %253 = vector.broadcast %252 : vector<8x1xf32> to vector<8x8xf32>
    %254 = arith.subf %250, %253 : vector<8x8xf32>
    %255 = math.exp %254 : vector<8x8xf32>
    %cst_110 = arith.constant dense<0.000000e+00> : vector<8xf32>
    %256 = vector.multi_reduction <add>, %255, %cst_110 [1] : vector<8x8xf32> to vector<8xf32>
    %257 = vector.shape_cast %256 : vector<8xf32> to vector<8x1xf32>
    %258 = tpu.reciprocal %257 {approx = true} : vector<8x1xf32> -> vector<8x1xf32>
    %259 = vector.broadcast %258 : vector<8x1xf32> to vector<8x8xf32>
    %260 = arith.mulf %255, %259 : vector<8x8xf32>
    %cst_111 = arith.constant dense<0.000000e+00> : vector<8x16xf32>
    %261 = tpu.matmul %260, %245, %cst_111 {dimension_numbers = #tpu.dot_dimension_numbers<[1], [0], [0], [1], [0, 0, 1, 1], [], []>} : vector<8x8xf32>, vector<8x16xf32>, vector<8x16xf32> -> vector<8x16xf32>
    %262 = tpu.concatenate %242, %261 in 1 : vector<8x16xf32>, vector<8x16xf32> -> vector<8x32xf32>
    %c1_112 = arith.constant 1 : index
    %c0_113 = arith.constant 0 : index
    %c0_114 = arith.constant 0 : index
    %263 = vector.load %arg3[%c1_112, %c0_113, %c0_114] : memref<2x1x8xf32, #tpu.memory_space<vmem>>, vector<1x1x8xf32>
    %264 = vector.shape_cast %263 : vector<1x1x8xf32> to vector<1x8xf32>
    %265 = vector.extract_strided_slice %219 {offsets = [8, 0], sizes = [8, 16], strides = [1, 1]} : vector<16x32xf32> to vector<8x16xf32>
    %266 = vector.extract_strided_slice %220 {offsets = [8, 0], sizes = [8, 16], strides = [1, 1]} : vector<16x32xf32> to vector<8x16xf32>
    %267 = vector.extract_strided_slice %221 {offsets = [8, 0], sizes = [8, 16], strides = [1, 1]} : vector<16x32xf32> to vector<8x16xf32>
    %cst_115 = arith.constant dense<0.000000e+00> : vector<8x8xf32>
    %268 = tpu.matmul %265, %266, %cst_115 {dimension_numbers = #tpu.dot_dimension_numbers<[1], [1], [0], [0], [0, 0, 1, 0], [], []>} : vector<8x16xf32>, vector<8x16xf32>, vector<8x8xf32> -> vector<8x8xf32>
    %cst_116 = arith.constant 2.500000e-01 : f32
    %269 = vector.broadcast %cst_116 : f32 to vector<8x8xf32>
    %270 = arith.mulf %268, %269 : vector<8x8xf32>
    %271 = vector.broadcast %264 : vector<1x8xf32> to vector<8x8xf32>
    %272 = arith.addf %270, %271 : vector<8x8xf32>
    %cst_117 = arith.constant dense<0xFF800000> : vector<8xf32>
    %273 = vector.multi_reduction <maximumf>, %272, %cst_117 [1] : vector<8x8xf32> to vector<8xf32>
    %274 = vector.shape_cast %273 : vector<8xf32> to vector<8x1xf32>
    %275 = vector.broadcast %274 : vector<8x1xf32> to vector<8x8xf32>
    %276 = arith.subf %272, %275 : vector<8x8xf32>
    %277 = math.exp %276 : vector<8x8xf32>
    %cst_118 = arith.constant dense<0.000000e+00> : vector<8xf32>
    %278 = vector.multi_reduction <add>, %277, %cst_118 [1] : vector<8x8xf32> to vector<8xf32>
    %279 = vector.shape_cast %278 : vector<8xf32> to vector<8x1xf32>
    %280 = tpu.reciprocal %279 {approx = true} : vector<8x1xf32> -> vector<8x1xf32>
    %281 = vector.broadcast %280 : vector<8x1xf32> to vector<8x8xf32>
    %282 = arith.mulf %277, %281 : vector<8x8xf32>
    %cst_119 = arith.constant dense<0.000000e+00> : vector<8x16xf32>
    %283 = tpu.matmul %282, %267, %cst_119 {dimension_numbers = #tpu.dot_dimension_numbers<[1], [0], [0], [1], [0, 0, 1, 1], [], []>} : vector<8x8xf32>, vector<8x16xf32>, vector<8x16xf32> -> vector<8x16xf32>
    %284 = vector.extract_strided_slice %219 {offsets = [8, 16], sizes = [8, 16], strides = [1, 1]} : vector<16x32xf32> to vector<8x16xf32>
    %285 = vector.extract_strided_slice %220 {offsets = [8, 16], sizes = [8, 16], strides = [1, 1]} : vector<16x32xf32> to vector<8x16xf32>
    %286 = vector.extract_strided_slice %221 {offsets = [8, 16], sizes = [8, 16], strides = [1, 1]} : vector<16x32xf32> to vector<8x16xf32>
    %cst_120 = arith.constant dense<0.000000e+00> : vector<8x8xf32>
    %287 = tpu.matmul %284, %285, %cst_120 {dimension_numbers = #tpu.dot_dimension_numbers<[1], [1], [0], [0], [0, 0, 1, 0], [], []>} : vector<8x16xf32>, vector<8x16xf32>, vector<8x8xf32> -> vector<8x8xf32>
    %cst_121 = arith.constant 2.500000e-01 : f32
    %288 = vector.broadcast %cst_121 : f32 to vector<8x8xf32>
    %289 = arith.mulf %287, %288 : vector<8x8xf32>
    %290 = vector.broadcast %264 : vector<1x8xf32> to vector<8x8xf32>
    %291 = arith.addf %289, %290 : vector<8x8xf32>
    %cst_122 = arith.constant dense<0xFF800000> : vector<8xf32>
    %292 = vector.multi_reduction <maximumf>, %291, %cst_122 [1] : vector<8x8xf32> to vector<8xf32>
    %293 = vector.shape_cast %292 : vector<8xf32> to vector<8x1xf32>
    %294 = vector.broadcast %293 : vector<8x1xf32> to vector<8x8xf32>
    %295 = arith.subf %291, %294 : vector<8x8xf32>
    %296 = math.exp %295 : vector<8x8xf32>
    %cst_123 = arith.constant dense<0.000000e+00> : vector<8xf32>
    %297 = vector.multi_reduction <add>, %296, %cst_123 [1] : vector<8x8xf32> to vector<8xf32>
    %298 = vector.shape_cast %297 : vector<8xf32> to vector<8x1xf32>
    %299 = tpu.reciprocal %298 {approx = true} : vector<8x1xf32> -> vector<8x1xf32>
    %300 = vector.broadcast %299 : vector<8x1xf32> to vector<8x8xf32>
    %301 = arith.mulf %296, %300 : vector<8x8xf32>
    %cst_124 = arith.constant dense<0.000000e+00> : vector<8x16xf32>
    %302 = tpu.matmul %301, %286, %cst_124 {dimension_numbers = #tpu.dot_dimension_numbers<[1], [0], [0], [1], [0, 0, 1, 1], [], []>} : vector<8x8xf32>, vector<8x16xf32>, vector<8x16xf32> -> vector<8x16xf32>
    %303 = tpu.concatenate %283, %302 in 1 : vector<8x16xf32>, vector<8x16xf32> -> vector<8x32xf32>
    %304 = tpu.concatenate %262, %303 in 0 : vector<8x32xf32>, vector<8x32xf32> -> vector<16x32xf32>
    %c1_125 = arith.constant 1 : index
    %c0_126 = arith.constant 0 : index
    %c0_127 = arith.constant 0 : index
    %305 = vector.load %arg8[%c1_125, %c0_126, %c0_127] : memref<2x32x32xf32, #tpu.memory_space<vmem>>, vector<1x32x32xf32>
    %306 = vector.shape_cast %305 : vector<1x32x32xf32> to vector<32x32xf32>
    %cst_128 = arith.constant dense<0.000000e+00> : vector<16x32xf32>
    %307 = tpu.matmul %304, %306, %cst_128 {dimension_numbers = #tpu.dot_dimension_numbers<[1], [0], [0], [1], [0, 0, 1, 1], [], []>} : vector<16x32xf32>, vector<32x32xf32>, vector<16x32xf32> -> vector<16x32xf32>
    %c1_129 = arith.constant 1 : index
    %c0_130 = arith.constant 0 : index
    %c0_131 = arith.constant 0 : index
    %308 = vector.load %arg9[%c1_129, %c0_130, %c0_131] : memref<2x1x32xf32, #tpu.memory_space<vmem>>, vector<1x1x32xf32>
    %309 = vector.shape_cast %308 : vector<1x1x32xf32> to vector<1x32xf32>
    %310 = vector.broadcast %309 : vector<1x32xf32> to vector<16x32xf32>
    %311 = arith.addf %307, %310 : vector<16x32xf32>
    %312 = arith.addf %311, %211 : vector<16x32xf32>
    %c1_132 = arith.constant 1 : index
    %c0_133 = arith.constant 0 : index
    %c0_134 = arith.constant 0 : index
    %313 = vector.load %arg10[%c1_132, %c0_133, %c0_134] : memref<2x1x32xf32, #tpu.memory_space<vmem>>, vector<1x1x32xf32>
    %314 = vector.shape_cast %313 : vector<1x1x32xf32> to vector<1x32xf32>
    %c1_135 = arith.constant 1 : index
    %c0_136 = arith.constant 0 : index
    %c0_137 = arith.constant 0 : index
    %315 = vector.load %arg11[%c1_135, %c0_136, %c0_137] : memref<2x1x32xf32, #tpu.memory_space<vmem>>, vector<1x1x32xf32>
    %316 = vector.shape_cast %315 : vector<1x1x32xf32> to vector<1x32xf32>
    %cst_138 = arith.constant dense<0.000000e+00> : vector<16xf32>
    %317 = vector.multi_reduction <add>, %312, %cst_138 [1] : vector<16x32xf32> to vector<16xf32>
    %318 = vector.shape_cast %317 : vector<16xf32> to vector<16x1xf32>
    %cst_139 = arith.constant 3.200000e+01 : f32
    %319 = vector.broadcast %cst_139 : f32 to vector<16x1xf32>
    %320 = arith.divf %318, %319 : vector<16x1xf32>
    %321 = vector.broadcast %320 : vector<16x1xf32> to vector<16x32xf32>
    %322 = arith.subf %312, %321 : vector<16x32xf32>
    %323 = arith.mulf %322, %322 : vector<16x32xf32>
    %cst_140 = arith.constant dense<0.000000e+00> : vector<16xf32>
    %324 = vector.multi_reduction <add>, %323, %cst_140 [1] : vector<16x32xf32> to vector<16xf32>
    %325 = vector.shape_cast %324 : vector<16xf32> to vector<16x1xf32>
    %cst_141 = arith.constant 3.200000e+01 : f32
    %326 = vector.broadcast %cst_141 : f32 to vector<16x1xf32>
    %327 = arith.divf %325, %326 : vector<16x1xf32>
    %328 = vector.broadcast %320 : vector<16x1xf32> to vector<16x32xf32>
    %329 = arith.subf %312, %328 : vector<16x32xf32>
    %cst_142 = arith.constant 9.99999996E-13 : f32
    %330 = vector.broadcast %cst_142 : f32 to vector<16x1xf32>
    %331 = arith.addf %327, %330 : vector<16x1xf32>
    %332 = math.rsqrt %331 : vector<16x1xf32>
    %333 = vector.broadcast %332 : vector<16x1xf32> to vector<16x32xf32>
    %334 = arith.mulf %329, %333 : vector<16x32xf32>
    %335 = vector.broadcast %314 : vector<1x32xf32> to vector<16x32xf32>
    %336 = arith.mulf %334, %335 : vector<16x32xf32>
    %337 = vector.broadcast %316 : vector<1x32xf32> to vector<16x32xf32>
    %338 = arith.addf %336, %337 : vector<16x32xf32>
    %c1_143 = arith.constant 1 : index
    %c0_144 = arith.constant 0 : index
    %c0_145 = arith.constant 0 : index
    %339 = vector.load %arg12[%c1_143, %c0_144, %c0_145] : memref<2x32x64xf32, #tpu.memory_space<vmem>>, vector<1x32x64xf32>
    %340 = vector.shape_cast %339 : vector<1x32x64xf32> to vector<32x64xf32>
    %cst_146 = arith.constant dense<0.000000e+00> : vector<16x64xf32>
    %341 = tpu.matmul %338, %340, %cst_146 {dimension_numbers = #tpu.dot_dimension_numbers<[1], [0], [0], [1], [0, 0, 1, 1], [], []>} : vector<16x32xf32>, vector<32x64xf32>, vector<16x64xf32> -> vector<16x64xf32>
    %c1_147 = arith.constant 1 : index
    %c0_148 = arith.constant 0 : index
    %c0_149 = arith.constant 0 : index
    %342 = vector.load %arg13[%c1_147, %c0_148, %c0_149] : memref<2x1x64xf32, #tpu.memory_space<vmem>>, vector<1x1x64xf32>
    %343 = vector.shape_cast %342 : vector<1x1x64xf32> to vector<1x64xf32>
    %344 = vector.broadcast %343 : vector<1x64xf32> to vector<16x64xf32>
    %345 = arith.addf %341, %344 : vector<16x64xf32>
    %346 = arith.mulf %345, %345 : vector<16x64xf32>
    %347 = arith.mulf %345, %346 : vector<16x64xf32>
    %cst_150 = arith.constant 4.471500e-02 : f32
    %348 = vector.broadcast %cst_150 : f32 to vector<16x64xf32>
    %349 = arith.mulf %348, %347 : vector<16x64xf32>
    %350 = arith.addf %345, %349 : vector<16x64xf32>
    %cst_151 = arith.constant 0.797884583 : f32
    %351 = vector.broadcast %cst_151 : f32 to vector<16x64xf32>
    %352 = arith.mulf %351, %350 : vector<16x64xf32>
    %353 = math.tanh %352 : vector<16x64xf32>
    %cst_152 = arith.constant 1.000000e+00 : f32
    %354 = vector.broadcast %cst_152 : f32 to vector<16x64xf32>
    %355 = arith.addf %354, %353 : vector<16x64xf32>
    %cst_153 = arith.constant 5.000000e-01 : f32
    %356 = vector.broadcast %cst_153 : f32 to vector<16x64xf32>
    %357 = arith.mulf %356, %355 : vector<16x64xf32>
    %358 = arith.mulf %345, %357 : vector<16x64xf32>
    %c1_154 = arith.constant 1 : index
    %c0_155 = arith.constant 0 : index
    %c0_156 = arith.constant 0 : index
    %359 = vector.load %arg14[%c1_154, %c0_155, %c0_156] : memref<2x64x32xf32, #tpu.memory_space<vmem>>, vector<1x64x32xf32>
    %360 = vector.shape_cast %359 : vector<1x64x32xf32> to vector<64x32xf32>
    %cst_157 = arith.constant dense<0.000000e+00> : vector<16x32xf32>
    %361 = tpu.matmul %358, %360, %cst_157 {dimension_numbers = #tpu.dot_dimension_numbers<[1], [0], [0], [1], [0, 0, 1, 1], [], []>} : vector<16x64xf32>, vector<64x32xf32>, vector<16x32xf32> -> vector<16x32xf32>
    %c1_158 = arith.constant 1 : index
    %c0_159 = arith.constant 0 : index
    %c0_160 = arith.constant 0 : index
    %362 = vector.load %arg15[%c1_158, %c0_159, %c0_160] : memref<2x1x32xf32, #tpu.memory_space<vmem>>, vector<1x1x32xf32>
    %363 = vector.shape_cast %362 : vector<1x1x32xf32> to vector<1x32xf32>
    %364 = vector.broadcast %363 : vector<1x32xf32> to vector<16x32xf32>
    %365 = arith.addf %361, %364 : vector<16x32xf32>
    %366 = arith.addf %365, %338 : vector<16x32xf32>
    %c1_161 = arith.constant 1 : index
    %c0_162 = arith.constant 0 : index
    %c0_163 = arith.constant 0 : index
    %367 = vector.load %arg16[%c1_161, %c0_162, %c0_163] : memref<2x1x32xf32, #tpu.memory_space<vmem>>, vector<1x1x32xf32>
    %368 = vector.shape_cast %367 : vector<1x1x32xf32> to vector<1x32xf32>
    %c1_164 = arith.constant 1 : index
    %c0_165 = arith.constant 0 : index
    %c0_166 = arith.constant 0 : index
    %369 = vector.load %arg17[%c1_164, %c0_165, %c0_166] : memref<2x1x32xf32, #tpu.memory_space<vmem>>, vector<1x1x32xf32>
    %370 = vector.shape_cast %369 : vector<1x1x32xf32> to vector<1x32xf32>
    %cst_167 = arith.constant dense<0.000000e+00> : vector<16xf32>
    %371 = vector.multi_reduction <add>, %366, %cst_167 [1] : vector<16x32xf32> to vector<16xf32>
    %372 = vector.shape_cast %371 : vector<16xf32> to vector<16x1xf32>
    %cst_168 = arith.constant 3.200000e+01 : f32
    %373 = vector.broadcast %cst_168 : f32 to vector<16x1xf32>
    %374 = arith.divf %372, %373 : vector<16x1xf32>
    %375 = vector.broadcast %374 : vector<16x1xf32> to vector<16x32xf32>
    %376 = arith.subf %366, %375 : vector<16x32xf32>
    %377 = arith.mulf %376, %376 : vector<16x32xf32>
    %cst_169 = arith.constant dense<0.000000e+00> : vector<16xf32>
    %378 = vector.multi_reduction <add>, %377, %cst_169 [1] : vector<16x32xf32> to vector<16xf32>
    %379 = vector.shape_cast %378 : vector<16xf32> to vector<16x1xf32>
    %cst_170 = arith.constant 3.200000e+01 : f32
    %380 = vector.broadcast %cst_170 : f32 to vector<16x1xf32>
    %381 = arith.divf %379, %380 : vector<16x1xf32>
    %382 = vector.broadcast %374 : vector<16x1xf32> to vector<16x32xf32>
    %383 = arith.subf %366, %382 : vector<16x32xf32>
    %cst_171 = arith.constant 9.99999996E-13 : f32
    %384 = vector.broadcast %cst_171 : f32 to vector<16x1xf32>
    %385 = arith.addf %381, %384 : vector<16x1xf32>
    %386 = math.rsqrt %385 : vector<16x1xf32>
    %387 = vector.broadcast %386 : vector<16x1xf32> to vector<16x32xf32>
    %388 = arith.mulf %383, %387 : vector<16x32xf32>
    %389 = vector.broadcast %368 : vector<1x32xf32> to vector<16x32xf32>
    %390 = arith.mulf %388, %389 : vector<16x32xf32>
    %391 = vector.broadcast %370 : vector<1x32xf32> to vector<16x32xf32>
    %392 = arith.addf %390, %391 : vector<16x32xf32>
    %c0_172 = arith.constant 0 : index
    %c0_173 = arith.constant 0 : index
    %393 = vector.load %arg20[%c0_172, %c0_173] : memref<16x32xf32, #tpu.memory_space<vmem>>, vector<16x32xf32>
    tpu.vector_store %arg20[%c0_172, %c0_173], %392 {strides = array<i32>} : memref<16x32xf32, #tpu.memory_space<vmem>>, vector<16x32xf32>,
    %394 = vector.extract_strided_slice %392 {offsets = [0, 0], sizes = [1, 32], strides = [1, 1]} : vector<16x32xf32> to vector<1x32xf32>
    %395 = vector.extract_strided_slice %392 {offsets = [8, 0], sizes = [1, 32], strides = [1, 1]} : vector<16x32xf32> to vector<1x32xf32>
    %396 = tpu.concatenate %394, %395 in 0 : vector<1x32xf32>, vector<1x32xf32> -> vector<2x32xf32>
    %c0_174 = arith.constant 0 : index
    %c0_175 = arith.constant 0 : index
    %397 = vector.load %arg18[%c0_174, %c0_175] : memref<32x32xf32, #tpu.memory_space<vmem>>, vector<32x32xf32>
    %cst_176 = arith.constant dense<0.000000e+00> : vector<2x32xf32>
    %398 = tpu.matmul %396, %397, %cst_176 {dimension_numbers = #tpu.dot_dimension_numbers<[1], [0], [0], [1], [0, 0, 1, 1], [], []>} : vector<2x32xf32>, vector<32x32xf32>, vector<2x32xf32> -> vector<2x32xf32>
    %c0_177 = arith.constant 0 : index
    %c0_178 = arith.constant 0 : index
    %399 = vector.load %arg19[%c0_177, %c0_178] : memref<1x32xf32, #tpu.memory_space<vmem>>, vector<1x32xf32>
    %400 = vector.broadcast %399 : vector<1x32xf32> to vector<2x32xf32>
    %401 = arith.addf %398, %400 : vector<2x32xf32>
    %402 = math.tanh %401 : vector<2x32xf32>
    %c0_179 = arith.constant 0 : index
    %c0_180 = arith.constant 0 : index
    %403 = vector.load %arg21[%c0_179, %c0_180] : memref<2x32xf32, #tpu.memory_space<vmem>>, vector<2x32xf32>
    tpu.vector_store %arg21[%c0_179, %c0_180], %402 {strides = array<i32>} : memref<2x32xf32, #tpu.memory_space<vmem>>, vector<2x32xf32>,
    return
  }
}

</mosaic_0001>

<bundles_post_ra>
// kernel: dummy_module_forward.1
= control target key start
LH: loop header
LB: loop body
LE: loop exit
PB: predicated region body
PF: predicated region fallthrough
CT: control target
= control target key end

     0   :  { %s3761_s0 = inlined_call_operand.vmem [shape: f32[16,32], index: 0, kind: input, shape index: {}]   ;;  %s3762_s1 = inlined_call_operand.vmem [shape: f32[8,32], index: 1, kind: input, shape index: {}]   ;;  %s3763_s2 = inlined_call_operand.vmem [shape: f32[1,32], index: 2, kind: input, shape index: {}]   ;;  %s3764_s3 = inlined_call_operand.vmem [shape: f32[2,1,8], index: 3, kind: input, shape index: {}]   ;;  %s3765_s4 = inlined_call_operand.vmem [shape: f32[1,32], index: 4, kind: input, shape index: {}]   ;;  %s3766_s5 = inlined_call_operand.vmem [shape: f32[1,32], index: 5, kind: input, shape index: {}]   ;;  %s3767_s6 = inlined_call_operand.vmem [shape: f32[2,32,96], index: 6, kind: input, shape index: {}]   ;;  %s3768_s7 = inlined_call_operand.vmem [shape: f32[2,1,96], index: 7, kind: input, shape index: {}]   ;;  %s3769_s8 = inlined_call_operand.vmem [shape: f32[2,32,32], index: 8, kind: input, shape index: {}]   ;;  %s3770_s9 = inlined_call_operand.vmem [shape: f32[2,1,32], index: 9, kind: input, shape index: {}]   ;;  %s3771_s10 = inlined_call_operand.vmem [shape: f32[2,1,32], index: 10, kind: input, shape index: {}]   ;;  %s3772_s11 = inlined_call_operand.vmem [shape: f32[2,1,32], index: 11, kind: input, shape index: {}]   ;;  %s3773_s12 = inlined_call_operand.vmem [shape: f32[2,32,64], index: 12, kind: input, shape index: {}]   ;;  %s3774_s13 = inlined_call_operand.vmem [shape: f32[2,1,64], index: 13, kind: input, shape index: {}]   ;;  %s3775_s14 = inlined_call_operand.vmem [shape: f32[2,64,32], index: 14, kind: input, shape index: {}]   ;;  %s3776_s15 = inlined_call_operand.vmem [shape: f32[2,1,32], index: 15, kind: input, shape index: {}]   ;;  %s3777_s16 = inlined_call_operand.vmem [shape: f32[2,1,32], index: 16, kind: input, shape index: {}]   ;;  %s3778_s17 = inlined_call_operand.vmem [shape: f32[2,1,32], index: 17, kind: input, shape index: {}]   ;;  %s3779_s18 = inlined_call_operand.vmem [shape: f32[32,32], index: 18, kind: input, shape index: {}]   ;;  %s3780_s19 = inlined_call_operand.vmem [shape: f32[1,32], index: 19, kind: input, shape index: {}]   ;;  %s3781_s20 = inlined_call_operand.hbm [shape: f32[16,32], index: 20, kind: output, shape index: {0}]   ;;  %s3782_s21 = inlined_call_operand.hbm [shape: f32[2,32], index: 21, kind: output, shape index: {1}]  }
   0x1   :  { %3785 = sst [smem:[#allocation8_spill]] %s3761_s0 }
   0x2   :  { %3786 = sst [smem:[#allocation9_spill]] %s3762_s1 }
   0x3   :  { %3787 = sst [smem:[#allocation10_spill]] %s3763_s2 }
   0x4   :  { %3788 = sst [smem:[#allocation11_spill]] %s3764_s3 }
   0x5   :  { %3789 = sst [smem:[#allocation12_spill]] %s3765_s4 }
   0x6   :  { %3790 = sst [smem:[#allocation13_spill]] %s3766_s5 }
   0x7   :  { %27 = vsyncpa [#allocation3], 0  ;;  %s3791_s26 = sld [smem:[#allocation9_spill]]  ;;  %s3792_s28 = sld [smem:[#allocation10_spill]] }
   0x8   :  { %s3793_s4 = sld [smem:[#allocation8_spill]] }
   0xd   :  { %v69_v0 = vld [vmem:[%s3791_s26] sm:$0xff] }
   0xe   :  { %v2598_v1 = vld [vmem:[%s3792_s28] ss:$0 sm:$0xff]  ;;  %v79_v4 = vld [vmem:[%s3793_s4 + $0x8] sm:$0xff] }
   0xf   :  { %v78_v2 = vld [vmem:[%s3793_s4] sm:$0xff]  ;;  %v77_v3 = vadd.f32 %v2598_v1, %v69_v0 }
  0x10   :  { %28 = vsyncpa [#allocation5], 0  ;;  %vm84_vm0 = vcmask 261120   ;;  %v128_v19 = vld [vmem:[%s3767_s6] sm:$0xff]  ;;  %v129_v20 = vld [vmem:[%s3767_s6 + $0x8] sm:$0xff]  ;;  %s3794_s29 = sld [smem:[#allocation12_spill]] }
  0x11   :  { %v80_v5 = vadd.f32 %v78_v2, %v77_v3  ;;  %v81_v6 = vadd.f32 %v79_v4, %v77_v3  ;;  %v130_v21 = vld [vmem:[%s3767_s6 + $0x10] sm:$0xff]  ;;  %v2978_v22 = vpack.c.bf16 %v129_v20, %v128_v19  ;;  %v131_v23 = vld [vmem:[%s3767_s6 + $0x18] sm:$0xff]  ;;  %s3795_s30 = sld [smem:[#allocation13_spill]]  ;;  %v3187_v41 = vmov 0.0   ;;  %v2601_v42 = vld [vmem:[%s3768_s7] ss:$0 sm:$0xff] }
  0x12   :  { %v2982_v24 = vpack.c.bf16 %v131_v23, %v130_v21  ;;  %2794 = vmatprep.subr.mxu1 %v3187_v41  ;;  %vm3188_vm1 = vmmov 0   ;;  %s3189_s23 = smov 96   ;;  %s3190_s1 = smov 80   ;;  %vm224_vm2 = vcmask 130048   ;;  %vm307_vm3 = vcmask 64512  }
  0x13   :  { %v85_v7 = vsel %vm84_vm0, %v80_v5, 0.0  ;;  %v88_v8 = vsel %vm84_vm0, %v81_v6, 0.0  ;;  %2979 = vmatprep.subr.bf16.mxu0 %v2978_v22  ;;  %2796 = vmatprep.mubr.msk.f32.mxu1 %vm3188_vm1, %v3187_v41  ;;  %s3191_s24 = smov 112   ;;  %s3796_s26 = sld [smem:[#allocation11_spill]]  ;;  %vm1176_vm4 = vcmask 523264   ;;  %vm2479_vm5 = vcmask 1040384  }
  0x14   :  { %86 = vadd.xlane.f32.xlu0 %v85_v7  ;;  %2981 = vmatpush3.bf16.msra.mxu0 %v2978_v22  ;;  %s3192_s28 = smov 64   ;;  %s3194_s27 = smov 16  }
  0x15   :  { %2983 = vmatprep.subr.bf16.mxu0 %v2982_v24 }
  0x16   :  { %v2599_v32 = vld [vmem:[%s3794_s29] ss:$0 sm:$0xff]  ;;  %s3193_s29 = smov 48  }
  0x17   :  { %v2600_v34 = vld [vmem:[%s3795_s30] ss:$0 sm:$0xff] }
  0x18   :  { %89 = vadd.xlane.f32.xlu0 %v88_v8  ;;  %2985 = vmatpush3.bf16.msra.mxu0 %v2982_v24 }
  0x19   :  { %2814 = vmatprep.subr.mxu0 %v3187_v41  ;;  %v3388_v51 = vld [vmem:[%s3796_s26] ss:$0 sm:$0xff]  ;;  %v3395_v57 = vld [vmem:[%s3796_s26 + $0x1] ss:$0 sm:$0xff] }
  0xa1   :  { %v87_v9 = vpop.xlane.xlu0 %86 }
  0xa2   :  { %v92_v10 = vmul.f32 0.03125, %v87_v9 }
  0xa4   :  { %v94_v11 = vsub.f32 %v80_v5, %v92_v10 }
  0xa5   :  { %v90_v12 = vpop.xlane.xlu0 %89 }
  0xa6   :  { %v93_v13 = vmul.f32 0.03125, %v90_v12  ;;  %v96_v14 = vmul.f32 %v94_v11, %v94_v11 }
  0xa8   :  { %v95_v15 = vsub.f32 %v81_v6, %v93_v13  ;;  %v98_v16 = vsel %vm84_vm0, %v96_v14, 0.0 }
  0xa9   :  { %99 = vadd.xlane.f32.xlu1 %v98_v16 }
  0xaa   :  { %v97_v17 = vmul.f32 %v95_v15, %v95_v15 }
  0xac   :  { %v101_v18 = vsel %vm84_vm0, %v97_v17, 0.0 }
  0xad   :  { %102 = vadd.xlane.f32.xlu1 %v101_v18 }
 0x136   :  { %v100_v25 = vpop.xlane.xlu1 %99 }
 0x137   :  { %v104_v26 = vmul.f32 0.03125, %v100_v25 }
 0x139   :  { %v106_v27 = vadd.f32 1e-12, %v104_v26 }
 0x13a   :  { %v103_v28 = vpop.xlane.xlu1 %102 }
 0x13b   :  { %3077 = vrsqrt.f32 %v106_v27  ;;  %v105_v29 = vmul.f32 0.03125, %v103_v28 }
 0x13d   :  { %v107_v30 = vadd.f32 1e-12, %v105_v29 }
 0x13f   :  { %3079 = vrsqrt.f32 %v107_v30 }
 0x145   :  { %v3078_v31 = vpop.eup %3077 }
 0x146   :  { %v110_v33 = vmul.f32 %v3078_v31, %v94_v11 }
 0x148   :  { %v118_v35 = vmul.f32 %v2599_v32, %v110_v33 }
 0x149   :  { %v3080_v36 = vpop.eup %3079 }
 0x14a   :  { %v111_v37 = vmul.f32 %v3080_v36, %v95_v15  ;;  %v3344_v38 = vadd.f32 %v2600_v34, %v118_v35 }
 0x14c   :  { %v119_v39 = vmul.f32 %v2599_v32, %v111_v37  ;;  %2791 = vmatprep.mubr.msk.f32.mxu0 %vm84_vm0, %v3344_v38 }
 0x14e   :  { %v3348_v40 = vadd.f32 %v2600_v34, %v119_v39 }
 0x150   :  { %2792 = vmatmul.mubr.msk.f32.vlgmr.msra.gmra.mrb[0].mxu0 %vm84_vm0, %v3348_v40 }
 0x151   :  { %2816 = vmatprep.mubr.msk.f32.mxu0 %vm3188_vm1, %v3187_v41 }
 0x223   :  { %v2793_v43 = vpop.f32.mrb[0].mxu0 }
 0x224   :  { %v211_v44 = vpop.f32.mrb[1].mxu0  ;;  %v3367_v46 = vadd.f32 %v2793_v43, %v2601_v42 }
 0x225   :  { %v3361_v45 = vadd.f32 %v2601_v42, %v211_v44 }
 0x227   :  { %222 = vrot.lane.b32.xlu0 %v3361_v45, %s3189_s23 }
 0x22b   :  { %397 = vrot.lane.b32.xlu0 %v3361_v45, %s3190_s1 }
 0x22f   :  { %570 = vrot.lane.b32.xlu0 %v3367_v46, %s3189_s23 }
 0x233   :  { %741 = vrot.lane.b32.xlu0 %v3367_v46, %s3191_s24 }
 0x299   :  { %v223_v47 = vpop.permute.xlu0 %222 }
 0x29a   :  { %2795 = vmatpush3.xpose.msk.msra.mxu1 %vm224_vm2, %v223_v47 }
 0x29b   :  { %2799 = vmatprep.subr.mxu1 %v3187_v41 }
 0x29d   :  { %2797 = vmatmul.mubr.msk.f32.vlgmr.msra.gmra.mrb[0].mxu1 %vm224_vm2, %v3361_v45  ;;  %v398_v48 = vpop.permute.xlu0 %397 }
 0x29e   :  { %2801 = vmatprep.mubr.msk.f32.mxu1 %vm3188_vm1, %v3187_v41 }
 0x2a1   :  { %v571_v49 = vpop.permute.xlu0 %570 }
 0x2a2   :  { %2815 = vmatpush3.xpose.msk.msra.mxu0 %vm224_vm2, %v571_v49 }
 0x2a3   :  { %2824 = vmatprep.subr.mxu0 %v3187_v41 }
 0x2a5   :  { %2817 = vmatmul.mubr.msk.f32.vlgmr.msra.gmra.mrb[2].mxu0 %vm224_vm2, %v3367_v46  ;;  %v742_v7 = vpop.permute.xlu0 %741 }
 0x2a6   :  { %2826 = vmatprep.mubr.msk.f32.mxu0 %vm3188_vm1, %v3187_v41 }
 0x370   :  { %v295_v50 = vpop.f32.mrb[0].mxu1 }
 0x371   :  { %v299_v52 = vmul.f32 0.25, %v295_v50  ;;  %v2798_v53 = vpop.f32.mrb[1].mxu1 }
 0x372   :  { %v913_v53 = vld [vmem:[%s3769_s8] sm:$0xff] }
 0x373   :  { %v306_v54 = vadd.f32 %v3388_v51, %v299_v52 }
 0x375   :  { %v308_v55 = vsel %vm307_vm3, %v306_v54, -inf }
 0x376   :  { %309 = vmax.xlane.f32.xlu1 %v308_v55 }
 0x378   :  { %v642_v56 = vpop.f32.mrb[2].mxu0 }
 0x379   :  { %v646_v58 = vmul.f32 0.25, %v642_v56  ;;  %v2818_v59 = vpop.f32.mrb[3].mxu0  ;;  %v915_v56 = vld [vmem:[%s3769_s8 + $0x10] sm:$0xff] }
 0x37b   :  { %v653_v60 = vadd.f32 %v3395_v57, %v646_v58  ;;  %v916_v58 = vld [vmem:[%s3769_s8 + $0x18] sm:$0xff] }
 0x37c   :  { %v2990_v59 = vpack.c.bf16 %v916_v58, %v915_v56  ;;  %v1166_v56 = vld [vmem:[%s3775_s14 + $0x28] sm:$0xff] }
 0x37d   :  { %v654_v61 = vsel %vm307_vm3, %v653_v60, -inf }
 0x37e   :  { %655 = vmax.xlane.f32.xlu0 %v654_v61 }
 0x387   :  { %319 = vrot.lane.b32.xlu1 %v3361_v45, %s3192_s28 }
 0x38b   :  { %395 = vrot.lane.b32.xlu1 %v3361_v45, %s3191_s24 }
 0x403   :  { %v310_v62 = vpop.xlane.xlu1 %309 }
 0x404   :  { %v311_v63 = vsub.f32 %v306_v54, %v310_v62  ;;  %v914_v54 = vld [vmem:[%s3769_s8 + $0x8] sm:$0xff] }
 0x405   :  { %v2986_v55 = vpack.c.bf16 %v914_v54, %v913_v53  ;;  %v1164_v53 = vld [vmem:[%s3775_s14 + $0x18] sm:$0xff] }
 0x406   :  { %v312_v0 = vmul.f32 1.442695, %v311_v63 }
 0x407   :  { %v320_v1 = vpop.permute.xlu1 %319 }
 0x408   :  { %3081 = vpow2.f32 %v312_v0  ;;  %2800 = vmatpush3.msra.mxu1 %v320_v1 }
 0x409   :  { %2804 = vmatprep.subr.mxu1 %v3187_v41 }
 0x40b   :  { %v396_v4 = vpop.permute.xlu1 %395  ;;  %v656_v10 = vpop.xlane.xlu0 %655 }
 0x40c   :  { %v657_v11 = vsub.f32 %v653_v60, %v656_v10 }
 0x40e   :  { %v658_v15 = vmul.f32 1.442695, %v657_v11 }
 0x412   :  { %v3082_v2 = vpop.eup %3081 }
 0x413   :  { %v314_v3 = vsel %vm307_vm3, %v3082_v2, 0.0 }
 0x414   :  { %315 = vadd.xlane.f32.xlu1 %v314_v3 }
 0x425   :  { %743 = vrot.lane.b32.xlu1 %v3367_v46, %s3190_s1 }
 0x4a1   :  { %v316_v5 = vpop.xlane.xlu1 %315 }
 0x4a2   :  { %3083 = vrcp.f32 %v316_v5 }
 0x4a3   :  { %3085 = vpow2.f32 %v658_v15 }
 0x4a5   :  { %v744_v6 = vpop.permute.xlu1 %743 }
 0x4a6   :  { %2825 = vmatpush3.xpose.msk.msra.mxu0 %vm224_vm2, %v744_v6  ;;  %v2619_v6 = vld [vmem:[%s3770_s9] ss:$0 sm:$0xff] }
 0x4a7   :  { %2987 = vmatprep.subr.bf16.mxu0 %v2986_v55 }
 0x4a9   :  { %2827 = vmatmul.mubr.msk.f32.vlgmr.msra.gmra.mrb[4].mxu0 %vm224_vm2, %v742_v7 }
 0x4aa   :  { %2989 = vmatpush3.bf16.msra.mxu0 %v2986_v55  ;;  %v1165_v55 = vld [vmem:[%s3775_s14 + $0x20] sm:$0xff] }
 0x4ab   :  { %2991 = vmatprep.subr.bf16.mxu0 %v2990_v59  ;;  %v3010_v58 = vpack.c.bf16 %v1166_v56, %v1165_v55  ;;  %v2630_v55 = vld [vmem:[%s3777_s16] ss:$0 sm:$0xff] }
 0x4ac   :  { %v3084_v8 = vpop.eup %3083 }
 0x4ad   :  { %v318_v9 = vmul.f32 %v3084_v8, %v3082_v2  ;;  %v3086_v25 = vpop.eup %3085 }
 0x4ae   :  { %v660_v26 = vsel %vm307_vm3, %v3086_v25, 0.0  ;;  %2993 = vmatpush3.bf16.msra.mxu0 %v2990_v59  ;;  %v1167_v59 = vld [vmem:[%s3775_s14 + $0x30] sm:$0xff] }
 0x4af   :  { %2802 = vmatmul.mubr.msk.f32.vlgmr.msra.gmra.mrb[2].mxu1 %vm307_vm3, %v318_v9 }
 0x4b0   :  { %2805 = vmatpush3.xpose.msk.msra.mxu1 %vm224_vm2, %v398_v48  ;;  %2806 = vmatprep.mubr.msk.f32.mxu1 %vm3188_vm1, %v3187_v41 }
 0x4b1   :  { %2809 = vmatprep.subr.mxu1 %v3187_v41 }
 0x4b3   :  { %2807 = vmatmul.mubr.msk.f32.vlgmr.msra.gmra.mrb[4].mxu1 %vm224_vm2, %v396_v4 }
 0x4b4   :  { %2811 = vmatprep.mubr.msk.f32.mxu1 %vm3188_vm1, %v3187_v41 }
 0x57c   :  { %v815_v12 = vpop.f32.mrb[4].mxu0 }
 0x57d   :  { %v819_v13 = vmul.f32 0.25, %v815_v12  ;;  %v2828_v14 = vpop.f32.mrb[5].mxu0 }
 0x57f   :  { %v820_v16 = vadd.f32 %v3395_v57, %v819_v13 }
 0x581   :  { %v821_v17 = vsel %vm307_vm3, %v820_v16, -inf }
 0x582   :  { %v3419_v18 = vpop.f32.mrb[2].mxu1  ;;  %822 = vmax.xlane.f32.xlu0 %v821_v17 }
 0x583   :  { %v2803_v19 = vpop.f32.mrb[3].mxu1 }
 0x586   :  { %v469_v20 = vpop.f32.mrb[4].mxu1 }
 0x587   :  { %v473_v21 = vmul.f32 0.25, %v469_v20  ;;  %v2808_v22 = vpop.f32.mrb[5].mxu1 }
 0x589   :  { %v474_v23 = vadd.f32 %v3388_v51, %v473_v21 }
 0x58b   :  { %v475_v24 = vsel %vm307_vm3, %v474_v23, -inf }
 0x58c   :  { %476 = vmax.xlane.f32.xlu1 %v475_v24  ;;  %v1052_v24 = vld [vmem:[%s3773_s12 + $0x8] sm:$0xff] }
 0x590   :  { %661 = vadd.xlane.f32.xlu1 %v660_v26  ;;  %v1053_v26 = vld [vmem:[%s3773_s12 + $0x10] sm:$0xff] }
 0x5a1   :  { %486 = vrot.lane.b32.xlu1 %v3361_v45, %s3193_s29 }
 0x5a5   :  { %832 = vrot.lane.b32.xlu1 %v3367_v46, %s3193_s29 }
 0x60f   :  { %v823_v27 = vpop.xlane.xlu0 %822 }
 0x610   :  { %v824_v28 = vsub.f32 %v820_v16, %v823_v27  ;;  %v1054_v27 = vld [vmem:[%s3773_s12 + $0x18] sm:$0xff] }
 0x612   :  { %v825_v29 = vmul.f32 1.442695, %v824_v28  ;;  %v2998_v28 = vpack.c.bf16 %v1054_v27, %v1053_v26 }
 0x614   :  { %3087 = vpow2.f32 %v825_v29 }
 0x619   :  { %v477_v30 = vpop.xlane.xlu1 %476 }
 0x61a   :  { %v478_v31 = vsub.f32 %v474_v23, %v477_v30 }
 0x61c   :  { %v479_v32 = vmul.f32 1.442695, %v478_v31 }
 0x61d   :  { %v662_v33 = vpop.xlane.xlu1 %661 }
 0x61e   :  { %v3088_v34 = vpop.eup %3087  ;;  %3089 = vpow2.f32 %v479_v32 }
 0x61f   :  { %v827_v35 = vsel %vm307_vm3, %v3088_v34, 0.0 }
 0x620   :  { %828 = vadd.xlane.f32.xlu0 %v827_v35 }
 0x621   :  { %v487_v36 = vpop.permute.xlu1 %486 }
 0x622   :  { %2810 = vmatpush3.msra.mxu1 %v487_v36  ;;  %v2622_v36 = vld [vmem:[%s3771_s10] ss:$0 sm:$0xff] }
 0x623   :  { %2819 = vmatprep.subr.mxu1 %v3187_v41 }
 0x628   :  { %v3090_v37 = vpop.eup %3089 }
 0x629   :  { %v481_v39 = vsel %vm307_vm3, %v3090_v37, 0.0 }
 0x62a   :  { %482 = vadd.xlane.f32.xlu0 %v481_v39  ;;  %v2623_v39 = vld [vmem:[%s3772_s11] ss:$0 sm:$0xff] }
 0x640   :  { %665 = vrot.lane.b32.xlu0 %v3367_v46, %s3192_s28  ;;  %v833_v46 = vpop.permute.xlu1 %832 }
 0x6ad   :  { %v829_v42 = vpop.xlane.xlu0 %828 }
 0x6b7   :  { %v483_v43 = vpop.xlane.xlu0 %482 }
 0x6b8   :  { %3091 = vrcp.f32 %v483_v43 }
 0x6b9   :  { %3093 = vrcp.f32 %v662_v33 }
 0x6ba   :  { %3095 = vrcp.f32 %v829_v42 }
 0x6bb   :  { %v666_v48 = vpop.permute.xlu0 %665 }
 0x6c2   :  { %v3092_v44 = vpop.eup %3091 }
 0x6c3   :  { %v485_v45 = vmul.f32 %v3092_v44, %v3090_v37  ;;  %v3094_v47 = vpop.eup %3093 }
 0x6c4   :  { %v664_v49 = vmul.f32 %v3094_v47, %v3086_v25  ;;  %v3096_v50 = vpop.eup %3095 }
 0x6c5   :  { %2812 = vmatmul.mubr.msk.f32.vlgmr.msra.gmra.mrb[6].mxu1 %vm307_vm3, %v485_v45  ;;  %v831_v52 = vmul.f32 %v3096_v50, %v3088_v34  ;;  %v1162_v50 = vld [vmem:[%s3775_s14 + $0x8] sm:$0xff] }
 0x6c6   :  { %2820 = vmatpush3.msra.mxu1 %v666_v48  ;;  %2821 = vmatprep.mubr.msk.f32.mxu1 %vm3188_vm1, %v3187_v41 }
 0x6c7   :  { %2829 = vmatprep.subr.mxu1 %v3187_v41 }
 0x6c9   :  { %2822 = vmatmul.mubr.msk.f32.vlgmr.msra.gmra.mrb[8].mxu1 %vm307_vm3, %v664_v49  ;;  %v1161_v49 = vld [vmem:[%s3775_s14] sm:$0xff] }
 0x6ca   :  { %2830 = vmatpush3.msra.mxu1 %v833_v46  ;;  %2831 = vmatprep.mubr.msk.f32.mxu1 %vm3188_vm1, %v3187_v41  ;;  %v3002_v46 = vpack.c.bf16 %v1162_v50, %v1161_v49 }
 0x6cc   :  { %3003 = vmatprep.subr.bf16.mxu0 %v3002_v46 }
 0x6cd   :  { %2832 = vmatmul.mubr.msk.f32.vlgmr.msra.gmra.mrb[10].mxu1 %vm307_vm3, %v831_v52  ;;  %v1163_v52 = vld [vmem:[%s3775_s14 + $0x10] sm:$0xff] }
 0x6ce   :  { %v3006_v54 = vpack.c.bf16 %v1164_v53, %v1163_v52 }
 0x798   :  { %v558_v60 = vpop.f32.mrb[6].mxu1 }
 0x799   :  { %563 = vrot.lane.b32.xlu1 %v558_v60, %s3194_s27  ;;  %v2813_v61 = vpop.f32.mrb[7].mxu1  ;;  %v1168_v60 = vld [vmem:[%s3775_s14 + $0x38] sm:$0xff] }
 0x79a   :  { %v3014_v61 = vpack.c.bf16 %v1168_v60, %v1167_v59  ;;  %v2631_v60 = vld [vmem:[%s3778_s17] ss:$0 sm:$0xff] }
 0x79c   :  { %v737_v62 = vpop.f32.mrb[8].mxu1 }
 0x79d   :  { %v2823_v63 = vpop.f32.mrb[9].mxu1 }
 0x7a0   :  { %v904_v0 = vpop.f32.mrb[10].mxu1 }
 0x7a1   :  { %909 = vrot.lane.b32.xlu1 %v904_v0, %s3194_s27  ;;  %v2833_v1 = vpop.f32.mrb[11].mxu1 }
 0x80b   :  { %v564_v2 = vpop.permute.xlu1 %563 }
 0x80c   :  { %v566_v3 = vsel %vm224_vm2, %v3419_v18, %v564_v2 }
 0x80d   :  { %2842 = vmatprep.mubr.msk.f32.mxu0 %vm84_vm0, %v566_v3 }
 0x813   :  { %v910_v4 = vpop.permute.xlu1 %909 }
 0x814   :  { %v912_v5 = vsel %vm224_vm2, %v737_v62, %v910_v4  ;;  %v2624_v62 = vld [vmem:[%s3774_s13] ss:$0 sm:$0xff] }
 0x815   :  { %2843 = vmatmul.mubr.msk.f32.vlgmr.msra.gmra.mrb[6].mxu0 %vm84_vm0, %v912_v5 }
 0x816   :  { %3005 = vmatpush3.bf16.msra.mxu0 %v3002_v46 }
 0x817   :  { %3007 = vmatprep.subr.bf16.mxu0 %v3006_v54 }
 0x81a   :  { %3009 = vmatpush3.bf16.msra.mxu0 %v3006_v54 }
 0x81b   :  { %3011 = vmatprep.subr.bf16.mxu0 %v3010_v58 }
 0x81e   :  { %3013 = vmatpush3.bf16.msra.mxu0 %v3010_v58 }
 0x81f   :  { %3015 = vmatprep.subr.bf16.mxu0 %v3014_v61 }
 0x822   :  { %3017 = vmatpush3.bf16.msra.mxu0 %v3014_v61 }
 0x823   :  { %2896 = vmatprep.subr.mxu0 %v3187_v41 }
 0x8e8   :  { %v2844_v7 = vpop.f32.mrb[6].mxu0 }
 0x8e9   :  { %v1002_v8 = vadd.f32 %v2844_v7, %v2619_v6  ;;  %v996_v9 = vpop.f32.mrb[7].mxu0 }
 0x8ea   :  { %v997_v10 = vadd.f32 %v2619_v6, %v996_v9 }
 0x8eb   :  { %v1006_v11 = vadd.f32 %v1002_v8, %v3348_v40 }
 0x8ec   :  { %v1005_v12 = vadd.f32 %v997_v10, %v3344_v38  ;;  %v1051_v38 = vld [vmem:[%s3773_s12] sm:$0xff] }
 0x8ed   :  { %v1012_v13 = vsel %vm84_vm0, %v1006_v11, 0.0  ;;  %v2994_v25 = vpack.c.bf16 %v1052_v24, %v1051_v38 }
 0x8ee   :  { %1013 = vadd.xlane.f32.xlu1 %v1012_v13  ;;  %v1009_v14 = vsel %vm84_vm0, %v1005_v12, 0.0 }
 0x8ef   :  { %1010 = vadd.xlane.f32.xlu0 %v1009_v14  ;;  %2995 = vmatprep.subr.bf16.mxu1 %v2994_v25 }
 0x8f0   :  { %2997 = vmatpush3.bf16.msra.mxu1 %v2994_v25 }
 0x8f1   :  { %2999 = vmatprep.subr.bf16.mxu1 %v2998_v28 }
 0x8f4   :  { %3001 = vmatpush3.bf16.msra.mxu1 %v2998_v28 }
 0x97b   :  { %v1014_v15 = vpop.xlane.xlu1 %1013 }
 0x97c   :  { %v1016_v16 = vmul.f32 0.03125, %v1014_v15  ;;  %v1011_v17 = vpop.xlane.xlu0 %1010 }
 0x97d   :  { %v1015_v18 = vmul.f32 0.03125, %v1011_v17 }
 0x97e   :  { %v1018_v19 = vsub.f32 %v1006_v11, %v1016_v16 }
 0x97f   :  { %v1017_v20 = vsub.f32 %v1005_v12, %v1015_v18 }
 0x980   :  { %v1020_v23 = vmul.f32 %v1018_v19, %v1018_v19 }
 0x981   :  { %v1019_v21 = vmul.f32 %v1017_v20, %v1017_v20 }
 0x982   :  { %v1024_v40 = vsel %vm84_vm0, %v1020_v23, 0.0 }
 0x983   :  { %v1021_v22 = vsel %vm84_vm0, %v1019_v21, 0.0  ;;  %v2627_v21 = vld [vmem:[%s3776_s15] ss:$0 sm:$0xff] }
 0x984   :  { %1022 = vadd.xlane.f32.xlu0 %v1021_v22 }
 0x988   :  { %1025 = vadd.xlane.f32.xlu0 %v1024_v40 }
 0xa11   :  { %v1023_v29 = vpop.xlane.xlu0 %1022 }
 0xa12   :  { %v1027_v30 = vmul.f32 0.03125, %v1023_v29 }
 0xa14   :  { %v1029_v31 = vadd.f32 1e-12, %v1027_v30 }
 0xa15   :  { %v1026_v32 = vpop.xlane.xlu0 %1025 }
 0xa16   :  { %3097 = vrsqrt.f32 %v1029_v31  ;;  %v1028_v33 = vmul.f32 0.03125, %v1026_v32 }
 0xa18   :  { %v1030_v34 = vadd.f32 1e-12, %v1028_v33 }
 0xa1a   :  { %3099 = vrsqrt.f32 %v1030_v34 }
 0xa20   :  { %v3098_v35 = vpop.eup %3097 }
 0xa21   :  { %v1033_v37 = vmul.f32 %v3098_v35, %v1017_v20 }
 0xa23   :  { %v1041_v42 = vmul.f32 %v2622_v36, %v1033_v37 }
 0xa24   :  { %v3100_v43 = vpop.eup %3099 }
 0xa25   :  { %v1034_v44 = vmul.f32 %v3100_v43, %v1018_v19  ;;  %v1049_v45 = vadd.f32 %v2623_v39, %v1041_v42  ;;  %v2633_v42 = vld [vmem:[%s3767_s6 + $0x28] sm:$0xff] }
 0xa27   :  { %v1042_v47 = vmul.f32 %v2622_v36, %v1034_v44  ;;  %2853 = vmatprep.mubr.msk.f32.mxu1 %vm84_vm0, %v1049_v45  ;;  %v2634_v44 = vld [vmem:[%s3767_s6 + $0x30] sm:$0xff] }
 0xa29   :  { %v1050_v48 = vadd.f32 %v2623_v39, %v1042_v47  ;;  %v2632_v39 = vld [vmem:[%s3767_s6 + $0x20] sm:$0xff] }
 0xa2a   :  { %v3018_v43 = vpack.c.bf16 %v2633_v42, %v2632_v39 }
 0xa2b   :  { %2854 = vmatmul.mubr.msk.f32.vlgmr.msra.gmra.mrb[12].mxu1 %vm84_vm0, %v1050_v48 }
 0xa2c   :  { %3019 = vmatprep.subr.bf16.mxu1 %v3018_v43 }
 0xa2d   :  { %3021 = vmatpush3.bf16.msra.mxu1 %v3018_v43 }
 0xafe   :  { %v2855_v63 = vpop.f32.mrb[12].mxu1 }
 0xaff   :  { %v1140_v0 = vadd.f32 %v2855_v63, %v2624_v62  ;;  %v1134_v1 = vpop.f32.mrb[13].mxu1 }
 0xb00   :  { %v1135_v2 = vadd.f32 %v2624_v62, %v1134_v1  ;;  %v2637_v1 = vld [vmem:[%s3768_s7 + $0x1] ss:$0 sm:$0xff] }
 0xb01   :  { %v1144_v3 = vmul.f32 %v1140_v0, %v1140_v0 }
 0xb02   :  { %v1143_v4 = vmul.f32 %v1135_v2, %v1135_v2 }
 0xb03   :  { %v1146_v5 = vmul.f32 %v1144_v3, %v1140_v0 }
 0xb04   :  { %v1145_v6 = vmul.f32 %v1143_v4, %v1135_v2 }
 0xb05   :  { %v1148_v7 = vmul.f32 0.044715, %v1146_v5 }
 0xb06   :  { %v1147_v8 = vmul.f32 0.044715, %v1145_v6 }
 0xb07   :  { %v1150_v9 = vadd.f32 %v1148_v7, %v1140_v0 }
 0xb08   :  { %v1149_v10 = vadd.f32 %v1147_v8, %v1135_v2 }
 0xb09   :  { %v1152_v11 = vmul.f32 0.7978846, %v1150_v9 }
 0xb0a   :  { %v1151_v12 = vmul.f32 0.7978846, %v1149_v10 }
 0xb0b   :  { %3101 = vtanh.f32 %v1152_v11 }
 0xb0c   :  { %3103 = vtanh.f32 %v1151_v12 }
 0xb15   :  { %v3102_v13 = vpop.eup %3101 }
 0xb16   :  { %v3104_v14 = vpop.eup %3103  ;;  %v1156_v15 = vadd.f32 1.0, %v3102_v13 }
 0xb17   :  { %v1155_v16 = vadd.f32 1.0, %v3104_v14 }
 0xb18   :  { %v1158_v17 = vmul.f32 0.5, %v1156_v15 }
 0xb19   :  { %v1157_v18 = vmul.f32 0.5, %v1155_v16 }
 0xb1a   :  { %v1160_v20 = vmul.f32 %v1158_v17, %v1140_v0 }
 0xb1b   :  { %v1159_v19 = vmul.f32 %v1157_v18, %v1135_v2 }
 0xb1d   :  { %2872 = vmatprep.mubr.msk.f32.mxu0 %vm1176_vm4, %v1159_v19 }
 0xb1e   :  { %2873 = vmatmul.mubr.msk.f32.vlgmr.msra.gmra.mrb[8].mxu0 %vm1176_vm4, %v1160_v20 }
 0xb1f   :  { %2898 = vmatprep.mubr.msk.f32.mxu0 %vm3188_vm1, %v3187_v41 }
 0xbf1   :  { %v2874_v22 = vpop.f32.mrb[8].mxu0 }
 0xbf2   :  { %v1255_v23 = vadd.f32 %v2874_v22, %v2627_v21  ;;  %v1249_v40 = vpop.f32.mrb[9].mxu0 }
 0xbf3   :  { %v1250_v38 = vadd.f32 %v2627_v21, %v1249_v40 }
 0xbf4   :  { %v1259_v24 = vadd.f32 %v1255_v23, %v1050_v48 }
 0xbf5   :  { %v1258_v25 = vadd.f32 %v1250_v38, %v1049_v45  ;;  %v2635_v45 = vld [vmem:[%s3767_s6 + $0x38] sm:$0xff] }
 0xbf6   :  { %v1265_v26 = vsel %vm84_vm0, %v1259_v24, 0.0  ;;  %v3022_v47 = vpack.c.bf16 %v2635_v45, %v2634_v44 }
 0xbf7   :  { %1266 = vadd.xlane.f32.xlu1 %v1265_v26  ;;  %v1262_v27 = vsel %vm84_vm0, %v1258_v25, 0.0 }
 0xbf8   :  { %1263 = vadd.xlane.f32.xlu0 %v1262_v27  ;;  %3023 = vmatprep.subr.bf16.mxu1 %v3022_v47 }
 0xbf9   :  { %3025 = vmatpush3.bf16.msra.mxu1 %v3022_v47 }
 0xbfa   :  { %2886 = vmatprep.subr.mxu1 %v3187_v41 }
 0xc84   :  { %v1267_v28 = vpop.xlane.xlu1 %1266 }
 0xc85   :  { %v1269_v29 = vmul.f32 0.03125, %v1267_v28  ;;  %v1264_v30 = vpop.xlane.xlu0 %1263 }
 0xc86   :  { %v1268_v31 = vmul.f32 0.03125, %v1264_v30 }
 0xc87   :  { %v1271_v32 = vsub.f32 %v1259_v24, %v1269_v29 }
 0xc88   :  { %v1270_v33 = vsub.f32 %v1258_v25, %v1268_v31 }
 0xc89   :  { %v1273_v34 = vmul.f32 %v1271_v32, %v1271_v32 }
 0xc8a   :  { %v1272_v35 = vmul.f32 %v1270_v33, %v1270_v33 }
 0xc8b   :  { %v1277_v36 = vsel %vm84_vm0, %v1273_v34, 0.0 }
 0xc8c   :  { %1278 = vadd.xlane.f32.xlu1 %v1277_v36  ;;  %v1274_v37 = vsel %vm84_vm0, %v1272_v35, 0.0 }
 0xc8d   :  { %1275 = vadd.xlane.f32.xlu0 %v1274_v37 }
 0xd19   :  { %v1279_v48 = vpop.xlane.xlu1 %1278 }
 0xd1a   :  { %v1281_v49 = vmul.f32 0.03125, %v1279_v48  ;;  %v1276_v50 = vpop.xlane.xlu0 %1275 }
 0xd1b   :  { %v1280_v46 = vmul.f32 0.03125, %v1276_v50 }
 0xd1c   :  { %v1283_v52 = vadd.f32 1e-12, %v1281_v49 }
 0xd1d   :  { %v1282_v53 = vadd.f32 1e-12, %v1280_v46 }
 0xd1e   :  { %3105 = vrsqrt.f32 %v1283_v52 }
 0xd1f   :  { %3107 = vrsqrt.f32 %v1282_v53 }
 0xd28   :  { %v3106_v54 = vpop.eup %3105 }
 0xd29   :  { %v3108_v56 = vpop.eup %3107  ;;  %v1287_v58 = vmul.f32 %v3106_v54, %v1271_v32 }
 0xd2a   :  { %v1286_v59 = vmul.f32 %v3108_v56, %v1270_v33 }
 0xd2b   :  { %v1295_v61 = vmul.f32 %v2630_v55, %v1287_v58 }
 0xd2c   :  { %v1294_v62 = vmul.f32 %v2630_v55, %v1286_v59 }
 0xd2d   :  { %v3549_v0 = vadd.f32 %v2631_v60, %v1295_v61 }
 0xd2e   :  { %v3547_v63 = vadd.f32 %v2631_v60, %v1294_v62 }
 0xd30   :  { %2883 = vmatprep.mubr.msk.f32.mxu1 %vm84_vm0, %v3547_v63 }
 0xd31   :  { %2884 = vmatmul.mubr.msk.f32.vlgmr.msra.gmra.mrb[14].mxu1 %vm84_vm0, %v3549_v0 }
 0xd32   :  { %2888 = vmatprep.mubr.msk.f32.mxu1 %vm3188_vm1, %v3187_v41 }
 0xe04   :  { %v2885_v2 = vpop.f32.mrb[14].mxu1 }
 0xe05   :  { %v1389_v3 = vpop.f32.mrb[15].mxu1  ;;  %v3566_v5 = vadd.f32 %v2885_v2, %v2637_v1 }
 0xe06   :  { %v3560_v4 = vadd.f32 %v2637_v1, %v1389_v3 }
 0xe08   :  { %1566 = vrot.lane.b32.xlu1 %v3560_v4, %s3190_s1  ;;  %1399 = vrot.lane.b32.xlu0 %v3560_v4, %s3189_s23 }
 0xe0c   :  { %1564 = vrot.lane.b32.xlu1 %v3560_v4, %s3191_s24  ;;  %1904 = vrot.lane.b32.xlu0 %v3566_v5, %s3190_s1 }
 0xe10   :  { %1737 = vrot.lane.b32.xlu1 %v3566_v5, %s3189_s23 }
 0xe14   :  { %1902 = vrot.lane.b32.xlu1 %v3566_v5, %s3191_s24 }
 0xe7a   :  { %v1567_v6 = vpop.permute.xlu1 %1566  ;;  %v1400_v7 = vpop.permute.xlu0 %1399 }
 0xe7b   :  { %2887 = vmatpush3.xpose.msk.msra.mxu1 %vm224_vm2, %v1400_v7  ;;  %2897 = vmatpush3.xpose.msk.msra.mxu0 %vm224_vm2, %v1567_v6  ;;  %v2652_v7 = vld [vmem:[%s3769_s8 + $0x20] sm:$0xff] }
 0xe7c   :  { %2906 = vmatprep.subr.mxu0 %v3187_v41  ;;  %2891 = vmatprep.subr.mxu1 %v3187_v41 }
 0xe7e   :  { %v1565_v8 = vpop.permute.xlu1 %1564  ;;  %2889 = vmatmul.mubr.msk.f32.vlgmr.msra.gmra.mrb[16].mxu1 %vm224_vm2, %v3560_v4  ;;  %v1905_v10 = vpop.permute.xlu0 %1904 }
 0xe7f   :  { %2899 = vmatmul.mubr.msk.f32.vlgmr.msra.gmra.mrb[10].mxu0 %vm224_vm2, %v1565_v8  ;;  %2893 = vmatprep.mubr.msk.f32.mxu1 %vm3188_vm1, %v3187_v41  ;;  %v2653_v8 = vld [vmem:[%s3769_s8 + $0x28] sm:$0xff] }
 0xe80   :  { %2908 = vmatprep.mubr.msk.f32.mxu0 %vm3188_vm1, %v3187_v41 }
 0xe82   :  { %v1738_v9 = vpop.permute.xlu1 %1737 }
 0xe83   :  { %2907 = vmatpush3.xpose.msk.msra.mxu0 %vm224_vm2, %v1738_v9  ;;  %v2654_v9 = vld [vmem:[%s3769_s8 + $0x30] sm:$0xff] }
 0xe84   :  { %2916 = vmatprep.subr.mxu0 %v3187_v41 }
 0xe86   :  { %2909 = vmatmul.mubr.msk.f32.vlgmr.msra.gmra.mrb[12].mxu0 %vm224_vm2, %v3566_v5  ;;  %v1903_v11 = vpop.permute.xlu1 %1902 }
 0xe87   :  { %2917 = vmatpush3.xpose.msk.msra.mxu0 %vm224_vm2, %v1905_v10  ;;  %2918 = vmatprep.mubr.msk.f32.mxu0 %vm3188_vm1, %v3187_v41  ;;  %v3026_v10 = vpack.c.bf16 %v2653_v8, %v2652_v7  ;;  %v2675_v7 = vld [vmem:[%s3775_s14 + $0x58] sm:$0xff]  ;;  %v2676_v8 = vld [vmem:[%s3775_s14 + $0x60] sm:$0xff] }
 0xe89   :  { %3027 = vmatprep.subr.bf16.mxu0 %v3026_v10 }
 0xe8a   :  { %2919 = vmatmul.mubr.msk.f32.vlgmr.msra.gmra.mrb[14].mxu0 %vm224_vm2, %v1903_v11  ;;  %v2655_v11 = vld [vmem:[%s3769_s8 + $0x38] sm:$0xff] }
 0xe8b   :  { %3029 = vmatpush3.bf16.msra.mxu0 %v3026_v10 }
 0xf51   :  { %v1471_v12 = vpop.f32.mrb[16].mxu1 }
 0xf52   :  { %v1475_v13 = vmul.f32 0.25, %v1471_v12  ;;  %v2890_v14 = vpop.f32.mrb[17].mxu1  ;;  %v1638_v15 = vpop.f32.mrb[10].mxu0  ;;  %v3030_v12 = vpack.c.bf16 %v2655_v11, %v2654_v9  ;;  %v2677_v9 = vld [vmem:[%s3775_s14 + $0x68] sm:$0xff]  ;;  %v2678_v11 = vld [vmem:[%s3775_s14 + $0x70] sm:$0xff] }
 0xf53   :  { %v1642_v16 = vmul.f32 0.25, %v1638_v15  ;;  %v2900_v17 = vpop.f32.mrb[11].mxu0  ;;  %v3050_v10 = vpack.c.bf16 %v2677_v9, %v2676_v8 }
 0xf54   :  { %v1476_v18 = vadd.f32 %v3388_v51, %v1475_v13  ;;  %3031 = vmatprep.subr.bf16.mxu0 %v3030_v12 }
 0xf55   :  { %v1643_v19 = vadd.f32 %v3388_v51, %v1642_v16  ;;  %3033 = vmatpush3.bf16.msra.mxu0 %v3030_v12  ;;  %v2679_v12 = vld [vmem:[%s3775_s14 + $0x78] sm:$0xff] }
 0xf56   :  { %v1477_v20 = vsel %vm307_vm3, %v1476_v18, -inf }
 0xf57   :  { %1478 = vmax.xlane.f32.xlu0 %v1477_v20  ;;  %v1644_v21 = vsel %vm307_vm3, %v1643_v19, -inf }
 0xf58   :  { %1645 = vmax.xlane.f32.xlu1 %v1644_v21 }
 0xf59   :  { %v1809_v22 = vpop.f32.mrb[12].mxu0 }
 0xf5a   :  { %v1813_v23 = vmul.f32 0.25, %v1809_v22  ;;  %v2910_v40 = vpop.f32.mrb[13].mxu0 }
 0xf5c   :  { %v1814_v38 = vadd.f32 %v3395_v57, %v1813_v23 }
 0xf5d   :  { %v1976_v24 = vpop.f32.mrb[14].mxu0 }
 0xf5e   :  { %v1980_v25 = vmul.f32 0.25, %v1976_v24  ;;  %v2920_v26 = vpop.f32.mrb[15].mxu0  ;;  %v1815_v27 = vsel %vm307_vm3, %v1814_v38, -inf }
 0xf5f   :  { %1816 = vmax.xlane.f32.xlu0 %v1815_v27 }
 0xf60   :  { %v1981_v28 = vadd.f32 %v3395_v57, %v1980_v25 }
 0xf62   :  { %v1982_v51 = vsel %vm307_vm3, %v1981_v28, -inf }
 0xf63   :  { %1983 = vmax.xlane.f32.xlu0 %v1982_v51 }
 0xfe4   :  { %v1479_v29 = vpop.xlane.xlu0 %1478 }
 0xfe5   :  { %v1480_v30 = vsub.f32 %v1476_v18, %v1479_v29  ;;  %v1646_v31 = vpop.xlane.xlu1 %1645 }
 0xfe6   :  { %v1647_v32 = vsub.f32 %v1643_v19, %v1646_v31 }
 0xfe7   :  { %v1481_v33 = vmul.f32 1.442695, %v1480_v30 }
 0xfe8   :  { %v1648_v34 = vmul.f32 1.442695, %v1647_v32 }
 0xfe9   :  { %3109 = vpow2.f32 %v1481_v33 }
 0xfea   :  { %3111 = vpow2.f32 %v1648_v34 }
 0xfec   :  { %v1817_v35 = vpop.xlane.xlu0 %1816 }
 0xfed   :  { %v1818_v36 = vsub.f32 %v1814_v38, %v1817_v35  ;;  %v2657_v38 = vld [vmem:[%s3770_s9 + $0x1] ss:$0 sm:$0xff] }
 0xfef   :  { %v1819_v37 = vmul.f32 1.442695, %v1818_v36 }
 0xff0   :  { %v1984_v47 = vpop.xlane.xlu0 %1983 }
 0xff1   :  { %3113 = vpow2.f32 %v1819_v37  ;;  %v1985_v48 = vsub.f32 %v1981_v28, %v1984_v47 }
 0xff3   :  { %v3110_v39 = vpop.eup %3109  ;;  %v1986_v49 = vmul.f32 1.442695, %v1985_v48 }
 0xff4   :  { %v3112_v42 = vpop.eup %3111  ;;  %v1483_v43 = vsel %vm307_vm3, %v3110_v39, 0.0 }
 0xff5   :  { %1484 = vadd.xlane.f32.xlu0 %v1483_v43  ;;  %v1650_v57 = vsel %vm307_vm3, %v3112_v42, 0.0  ;;  %3115 = vpow2.f32 %v1986_v49  ;;  %v2665_v43 = vld [vmem:[%s3773_s12 + $0x28] sm:$0xff] }
 0xff6   :  { %1651 = vadd.xlane.f32.xlu1 %v1650_v57 }
 0xffb   :  { %v3114_v44 = vpop.eup %3113 }
 0xffc   :  { %v1821_v45 = vsel %vm307_vm3, %v3114_v44, 0.0 }
 0xffd   :  { %1822 = vadd.xlane.f32.xlu0 %v1821_v45  ;;  %v2667_v45 = vld [vmem:[%s3773_s12 + $0x38] sm:$0xff] }
 0xfff   :  { %v3116_v50 = vpop.eup %3115 }
0x1000   :  { %v1988_v46 = vsel %vm307_vm3, %v3116_v50, 0.0 }
0x1007   :  { %1655 = vrot.lane.b32.xlu1 %v3560_v4, %s3193_s29 }
0x100b   :  { %1826 = vrot.lane.b32.xlu1 %v3566_v5, %s3192_s28 }
0x1013   :  { %1488 = vrot.lane.b32.xlu0 %v3560_v4, %s3192_s28 }
0x102f   :  { %1989 = vadd.xlane.f32.xlu1 %v1988_v46 }
0x1040   :  { %1993 = vrot.lane.b32.xlu1 %v3566_v5, %s3193_s29 }
0x1082   :  { %v1485_v52 = vpop.xlane.xlu0 %1484 }
0x1083   :  { %3117 = vrcp.f32 %v1485_v52  ;;  %v1652_v53 = vpop.xlane.xlu1 %1651 }
0x1084   :  { %3119 = vrcp.f32 %v1652_v53 }
0x1087   :  { %v1656_v58 = vpop.permute.xlu1 %1655 }
0x108a   :  { %v1823_v54 = vpop.xlane.xlu0 %1822 }
0x108b   :  { %3121 = vrcp.f32 %v1823_v54  ;;  %v1827_v62 = vpop.permute.xlu1 %1826 }
0x108d   :  { %v3118_v55 = vpop.eup %3117 }
0x108e   :  { %v1487_v56 = vmul.f32 %v3118_v55, %v3110_v39  ;;  %v1489_v59 = vpop.permute.xlu0 %1488  ;;  %v3120_v60 = vpop.eup %3119  ;;  %v2662_v55 = vld [vmem:[%s3771_s10 + $0x1] ss:$0 sm:$0xff] }
0x108f   :  { %2892 = vmatpush3.msra.mxu1 %v1489_v59  ;;  %v1654_v61 = vmul.f32 %v3120_v60, %v3112_v42 }
0x1090   :  { %2894 = vmatmul.mubr.msk.f32.vlgmr.msra.gmra.mrb[18].mxu1 %vm307_vm3, %v1487_v56  ;;  %2901 = vmatprep.subr.mxu1 %v3187_v41 }
0x1091   :  { %2902 = vmatpush3.msra.mxu1 %v1656_v58  ;;  %2903 = vmatprep.mubr.msk.f32.mxu1 %vm3188_vm1, %v3187_v41  ;;  %v2663_v58 = vld [vmem:[%s3772_s11 + $0x1] ss:$0 sm:$0xff] }
0x1092   :  { %2911 = vmatprep.subr.mxu1 %v3187_v41 }
0x1094   :  { %2904 = vmatmul.mubr.msk.f32.vlgmr.msra.gmra.mrb[20].mxu1 %vm307_vm3, %v1654_v61 }
0x1095   :  { %v3122_v1 = vpop.eup %3121  ;;  %2912 = vmatpush3.msra.mxu1 %v1827_v62  ;;  %2913 = vmatprep.mubr.msk.f32.mxu1 %vm3188_vm1, %v3187_v41 }
0x1096   :  { %v1825_v2 = vmul.f32 %v3122_v1, %v3114_v44  ;;  %2921 = vmatprep.subr.mxu1 %v3187_v41  ;;  %v2666_v44 = vld [vmem:[%s3773_s12 + $0x30] sm:$0xff] }
0x1097   :  { %v3038_v47 = vpack.c.bf16 %v2667_v45, %v2666_v44 }
0x1098   :  { %2914 = vmatmul.mubr.msk.f32.vlgmr.msra.gmra.mrb[22].mxu1 %vm307_vm3, %v1825_v2 }
0x1099   :  { %2923 = vmatprep.mubr.msk.f32.mxu1 %vm3188_vm1, %v3187_v41 }
0x10bc   :  { %v1990_v3 = vpop.xlane.xlu1 %1989 }
0x10bd   :  { %3123 = vrcp.f32 %v1990_v3  ;;  %v2672_v3 = vld [vmem:[%s3775_s14 + $0x40] sm:$0xff] }
0x10c0   :  { %v1994_v4 = vpop.permute.xlu1 %1993 }
0x10c1   :  { %2922 = vmatpush3.msra.mxu1 %v1994_v4  ;;  %v2673_v4 = vld [vmem:[%s3775_s14 + $0x48] sm:$0xff] }
0x10c7   :  { %v3124_v5 = vpop.eup %3123 }
0x10c8   :  { %v1992_v6 = vmul.f32 %v3124_v5, %v3116_v50  ;;  %v3042_v5 = vpack.c.bf16 %v2673_v4, %v2672_v3 }
0x10ca   :  { %2924 = vmatmul.mubr.msk.f32.vlgmr.msra.gmra.mrb[24].mxu1 %vm307_vm3, %v1992_v6  ;;  %3043 = vmatprep.subr.bf16.mxu0 %v3042_v5  ;;  %v2674_v6 = vld [vmem:[%s3775_s14 + $0x50] sm:$0xff] }
0x1163   :  { %v1560_v13 = vpop.f32.mrb[18].mxu1 }
0x1164   :  { %v2895_v14 = vpop.f32.mrb[19].mxu1 }
0x1165   :  { %v2669_v14 = vld [vmem:[%s3774_s13 + $0x1] ss:$0 sm:$0xff] }
0x1167   :  { %v1727_v15 = vpop.f32.mrb[20].mxu1 }
0x1168   :  { %1732 = vrot.lane.b32.xlu0 %v1727_v15, %s3194_s27  ;;  %v2905_v16 = vpop.f32.mrb[21].mxu1 }
0x116b   :  { %v1898_v17 = vpop.f32.mrb[22].mxu1 }
0x116c   :  { %v2915_v18 = vpop.f32.mrb[23].mxu1 }
0x119d   :  { %v2065_v19 = vpop.f32.mrb[24].mxu1 }
0x119e   :  { %2070 = vrot.lane.b32.xlu1 %v2065_v19, %s3194_s27  ;;  %v2925_v20 = vpop.f32.mrb[25].mxu1 }
0x11da   :  { %v1733_v21 = vpop.permute.xlu0 %1732 }
0x11db   :  { %v1735_v22 = vsel %vm224_vm2, %v1560_v13, %v1733_v21  ;;  %v3054_v13 = vpack.c.bf16 %v2679_v12, %v2678_v11 }
0x11dc   :  { %2934 = vmatprep.mubr.msk.f32.mxu0 %vm84_vm0, %v1735_v22 }
0x1210   :  { %v2071_v23 = vpop.permute.xlu1 %2070 }
0x1211   :  { %v2073_v40 = vsel %vm224_vm2, %v1898_v17, %v2071_v23 }
0x1212   :  { %2935 = vmatmul.mubr.msk.f32.vlgmr.msra.gmra.mrb[16].mxu0 %vm84_vm0, %v2073_v40 }
0x1213   :  { %3045 = vmatpush3.bf16.msra.mxu0 %v3042_v5 }
0x12e5   :  { %v2936_v24 = vpop.f32.mrb[16].mxu0 }
0x12e6   :  { %v2165_v25 = vadd.f32 %v2936_v24, %v2657_v38  ;;  %v2159_v26 = vpop.f32.mrb[17].mxu0 }
0x12e7   :  { %v2160_v27 = vadd.f32 %v2657_v38, %v2159_v26 }
0x12e8   :  { %v2169_v28 = vadd.f32 %v2165_v25, %v3549_v0 }
0x12e9   :  { %v2168_v51 = vadd.f32 %v2160_v27, %v3547_v63  ;;  %v2664_v63 = vld [vmem:[%s3773_s12 + $0x20] sm:$0xff] }
0x12ea   :  { %v2177_v29 = vsel %vm84_vm0, %v2169_v28, 0.0  ;;  %v3034_v57 = vpack.c.bf16 %v2665_v43, %v2664_v63 }
0x12eb   :  { %2178 = vadd.xlane.f32.xlu1 %v2177_v29  ;;  %v2174_v30 = vsel %vm84_vm0, %v2168_v51, 0.0 }
0x12ec   :  { %2175 = vadd.xlane.f32.xlu0 %v2174_v30  ;;  %3035 = vmatprep.subr.bf16.mxu1 %v3034_v57 }
0x12ed   :  { %3037 = vmatpush3.bf16.msra.mxu1 %v3034_v57 }
0x12ee   :  { %3039 = vmatprep.subr.bf16.mxu1 %v3038_v47 }
0x12f1   :  { %3041 = vmatpush3.bf16.msra.mxu1 %v3038_v47 }
0x1378   :  { %v2179_v31 = vpop.xlane.xlu1 %2178 }
0x1379   :  { %v2181_v32 = vmul.f32 0.03125, %v2179_v31  ;;  %v2176_v33 = vpop.xlane.xlu0 %2175 }
0x137a   :  { %v2180_v34 = vmul.f32 0.03125, %v2176_v33 }
0x137b   :  { %v2183_v35 = vsub.f32 %v2169_v28, %v2181_v32 }
0x137c   :  { %v2182_v36 = vsub.f32 %v2168_v51, %v2180_v34  ;;  %v2681_v34 = vld [vmem:[%s3776_s15 + $0x1] ss:$0 sm:$0xff] }
0x137d   :  { %v2185_v42 = vmul.f32 %v2183_v35, %v2183_v35 }
0x137e   :  { %v2184_v37 = vmul.f32 %v2182_v36, %v2182_v36 }
0x137f   :  { %v2189_v0 = vsel %vm84_vm0, %v2185_v42, 0.0 }
0x1380   :  { %v2186_v39 = vsel %vm84_vm0, %v2184_v37, 0.0 }
0x1381   :  { %2187 = vadd.xlane.f32.xlu0 %v2186_v39 }
0x1385   :  { %2190 = vadd.xlane.f32.xlu0 %v2189_v0 }
0x140e   :  { %v2188_v48 = vpop.xlane.xlu0 %2187 }
0x140f   :  { %v2192_v49 = vmul.f32 0.03125, %v2188_v48 }
0x1411   :  { %v2194_v50 = vadd.f32 1e-12, %v2192_v49 }
0x1412   :  { %v2191_v46 = vpop.xlane.xlu0 %2190 }
0x1413   :  { %3125 = vrsqrt.f32 %v2194_v50  ;;  %v2193_v52 = vmul.f32 0.03125, %v2191_v46 }
0x1415   :  { %v2195_v53 = vadd.f32 1e-12, %v2193_v52 }
0x1417   :  { %3127 = vrsqrt.f32 %v2195_v53 }
0x141d   :  { %v3126_v54 = vpop.eup %3125 }
0x141e   :  { %v2198_v56 = vmul.f32 %v3126_v54, %v2182_v36  ;;  %v2481_v54 = vld [vmem:[%s3779_s18] sm:$0xff] }
0x1420   :  { %v2206_v59 = vmul.f32 %v2662_v55, %v2198_v56 }
0x1421   :  { %v3128_v60 = vpop.eup %3127 }
0x1422   :  { %v2199_v61 = vmul.f32 %v3128_v60, %v2183_v35  ;;  %v2214_v62 = vadd.f32 %v2663_v58, %v2206_v59  ;;  %v2484_v59 = vld [vmem:[%s3779_s18 + $0x18] sm:$0xff]  ;;  %v3195_v60 = vmov 0.0|0.0  }
0x1423   :  { %3058 = vmatprep.subr.bf16.mxu1 %v3195_v60 }
0x1424   :  { %v2207_v1 = vmul.f32 %v2662_v55, %v2199_v61  ;;  %2945 = vmatprep.mubr.msk.f32.mxu1 %vm84_vm0, %v2214_v62  ;;  %v2482_v55 = vld [vmem:[%s3779_s18 + $0x8] sm:$0xff] }
0x1425   :  { %v3059_v56 = vpack.c.bf16 %v2482_v55, %v2481_v54 }
0x1426   :  { %v2215_v2 = vadd.f32 %v2663_v58, %v2207_v1  ;;  %v2483_v58 = vld [vmem:[%s3779_s18 + $0x10] sm:$0xff] }
0x1427   :  { %v3062_v61 = vpack.c.bf16 %v2484_v59, %v2483_v58 }
0x1428   :  { %2946 = vmatmul.mubr.msk.f32.vlgmr.msra.gmra.mrb[26].mxu1 %vm84_vm0, %v2215_v2 }
0x1429   :  { %2975 = vmatprep.mubr.msk.f32.mxu1 %vm3188_vm1, %v3187_v41  ;;  %v3046_v41 = vpack.c.bf16 %v2675_v7, %v2674_v6  ;;  %3060 = vmatpush3.bf16.msra.mxu1 %v3059_v56  ;;  %v2686_v7 = vld [vmem:[%s3777_s16 + $0x1] ss:$0 sm:$0xff]  ;;  %s3196_s16 = smov [#allocation2]  }
0x142a   :  { %3061 = vmatprep.subr.bf16.mxu1 %v3195_v60  ;;  %s2573_s4 = sshll.u32 %s3196_s16, 4  ;;  %s2574_s4 = int_to_ptr.vmem [resolvable:$true] %s2573_s4 }
0x142b   :  { %3047 = vmatprep.subr.bf16.mxu0 %v3046_v41  ;;  %s3139_s30 = scalar_lea.vmem %s2574_s4, 256  ;;  %p3144_p1 = scmp.lt.s32.totalorder %s2574_s4, %s2574_s4 }
0x142c   :  { %3049 = vmatpush3.bf16.msra.mxu0 %v3046_v41  ;;  %p3140_p0 = scmp.ne.s32.totalorder %s2574_s4, %s3139_s30  ;;  %p3145_p2 = scmp.lt.s32.totalorder %s3139_s30, %s3139_s30 }
0x142d   :  { %3051 = vmatprep.subr.bf16.mxu0 %v3050_v10  ;;  %3063 = vmatpush3.bf16.msra.mxu1 %v3062_v61 }
0x142e   :  { %p3146_p3 = por %p3145_p2, %p3144_p1 }
0x1430   :  { %3053 = vmatpush3.bf16.msra.mxu0 %v3050_v10  ;;  %v2687_v10 = vld [vmem:[%s3778_s17 + $0x1] ss:$0 sm:$0xff]  ;;  %p3147_p4 = pnand %p3146_p3, %p3140_p0 }
0x1431   :  { %3055 = vmatprep.subr.bf16.mxu0 %v3054_v13 }
0x1434   :  { %3057 = vmatpush3.bf16.msra.mxu0 %v3054_v13 }
0x14fb   :  { %v2947_v15 = vpop.f32.mrb[26].mxu1 }
0x14fc   :  { %v2307_v16 = vadd.f32 %v2947_v15, %v2669_v14  ;;  %v2301_v17 = vpop.f32.mrb[27].mxu1 }
0x14fd   :  { %v2302_v18 = vadd.f32 %v2669_v14, %v2301_v17 }
0x14fe   :  { %v2311_v19 = vmul.f32 %v2307_v16, %v2307_v16 }
0x14ff   :  { %v2310_v20 = vmul.f32 %v2302_v18, %v2302_v18 }
0x1500   :  { %v2313_v21 = vmul.f32 %v2311_v19, %v2307_v16 }
0x1501   :  { %v2312_v22 = vmul.f32 %v2310_v20, %v2302_v18 }
0x1502   :  { %v2315_v23 = vmul.f32 0.044715, %v2313_v21 }
0x1503   :  { %v2314_v40 = vmul.f32 0.044715, %v2312_v22 }
0x1504   :  { %v2317_v38 = vadd.f32 %v2315_v23, %v2307_v16 }
0x1505   :  { %v2316_v24 = vadd.f32 %v2314_v40, %v2302_v18 }
0x1506   :  { %v2319_v25 = vmul.f32 0.7978846, %v2317_v38 }
0x1507   :  { %v2318_v26 = vmul.f32 0.7978846, %v2316_v24 }
0x1508   :  { %3129 = vtanh.f32 %v2319_v25 }
0x1509   :  { %3131 = vtanh.f32 %v2318_v26 }
0x1512   :  { %v3130_v27 = vpop.eup %3129 }
0x1513   :  { %v3132_v28 = vpop.eup %3131  ;;  %v2323_v51 = vadd.f32 1.0, %v3130_v27 }
0x1514   :  { %v2322_v29 = vadd.f32 1.0, %v3132_v28 }
0x1515   :  { %v2325_v30 = vmul.f32 0.5, %v2323_v51 }
0x1516   :  { %v2324_v31 = vmul.f32 0.5, %v2322_v29 }
0x1517   :  { %v2327_v33 = vmul.f32 %v2325_v30, %v2307_v16 }
0x1518   :  { %v2326_v32 = vmul.f32 %v2324_v31, %v2302_v18 }
0x151a   :  { %2964 = vmatprep.mubr.msk.f32.mxu0 %vm1176_vm4, %v2326_v32 }
0x151b   :  { %2965 = vmatmul.mubr.msk.f32.vlgmr.msra.gmra.mrb[18].mxu0 %vm1176_vm4, %v2327_v33 }
0x15ee   :  { %v2966_v35 = vpop.f32.mrb[18].mxu0 }
0x15ef   :  { %v2423_v36 = vadd.f32 %v2966_v35, %v2681_v34  ;;  %v2417_v37 = vpop.f32.mrb[19].mxu0 }
0x15f0   :  { %v2418_v39 = vadd.f32 %v2681_v34, %v2417_v37 }
0x15f1   :  { %v2427_v42 = vadd.f32 %v2423_v36, %v2215_v2 }
0x15f2   :  { %v2426_v0 = vadd.f32 %v2418_v39, %v2214_v62 }
0x15f3   :  { %v2435_v63 = vsel %vm84_vm0, %v2427_v42, 0.0 }
0x15f4   :  { %2436 = vadd.xlane.f32.xlu0 %v2435_v63  ;;  %v2432_v43 = vsel %vm84_vm0, %v2426_v0, 0.0 }
0x15f5   :  { %2433 = vadd.xlane.f32.xlu1 %v2432_v43 }
0x1681   :  { %v2437_v57 = vpop.xlane.xlu0 %2436 }
0x1682   :  { %v2439_v44 = vmul.f32 0.03125, %v2437_v57  ;;  %v2434_v45 = vpop.xlane.xlu1 %2433 }
0x1683   :  { %v2438_v47 = vmul.f32 0.03125, %v2434_v45 }
0x1684   :  { %v2441_v48 = vsub.f32 %v2427_v42, %v2439_v44 }
0x1685   :  { %v2440_v49 = vsub.f32 %v2426_v0, %v2438_v47 }
0x1686   :  { %v2443_v50 = vmul.f32 %v2441_v48, %v2441_v48 }
0x1687   :  { %v2442_v46 = vmul.f32 %v2440_v49, %v2440_v49 }
0x1688   :  { %v2447_v52 = vsel %vm84_vm0, %v2443_v50, 0.0 }
0x1689   :  { %2448 = vadd.xlane.f32.xlu0 %v2447_v52  ;;  %v2444_v53 = vsel %vm84_vm0, %v2442_v46, 0.0 }
0x168a   :  { %2445 = vadd.xlane.f32.xlu1 %v2444_v53 }
0x1716   :  { %v2449_v62 = vpop.xlane.xlu0 %2448 }
0x1717   :  { %v2451_v1 = vmul.f32 0.03125, %v2449_v62  ;;  %v2446_v2 = vpop.xlane.xlu1 %2445 }
0x1718   :  { %v2450_v3 = vmul.f32 0.03125, %v2446_v2 }
0x1719   :  { %v2453_v4 = vadd.f32 1e-12, %v2451_v1 }
0x171a   :  { %v2452_v5 = vadd.f32 1e-12, %v2450_v3 }
0x171b   :  { %3133 = vrsqrt.f32 %v2453_v4 }
0x171c   :  { %3135 = vrsqrt.f32 %v2452_v5 }
0x1725   :  { %v3134_v6 = vpop.eup %3133 }
0x1726   :  { %v3136_v41 = vpop.eup %3135  ;;  %v2457_v8 = vmul.f32 %v3134_v6, %v2441_v48 }
0x1727   :  { %v2456_v9 = vmul.f32 %v3136_v41, %v2440_v49 }
0x1728   :  { %v2465_v11 = vmul.f32 %v2686_v7, %v2457_v8 }
0x1729   :  { %v2464_v12 = vmul.f32 %v2686_v7, %v2456_v9 }
0x172a   :  { %v2473_v13 = vadd.f32 %v2687_v10, %v2465_v11 }
0x172b   :  { %v2472_v14 = vadd.f32 %v2687_v10, %v2464_v12 }
0x172c   :  { %v2477_v15 = vrot.slane %v2473_v13, 7  ;;  %2475 = vst.msk [vmem:[#allocation2 + $0x8] sm:$0xff] %vm84_vm0, %v2473_v13 }
0x172d   :  { %2474 = vst.msk [vmem:[#allocation2] sm:$0xff] %vm84_vm0, %v2472_v14 }
0x172e   :  { %v2480_v16 = vsel %vm2479_vm5, %v2472_v14, %v2477_v15 }
0x172f   :  { %2976 = vmatmul.mubr.msk.f32.vlgmr.msra.gmra.mrb[28].mxu1 %vm84_vm0, %v2480_v16 }
0x1730   :  { %3150 = shalt.err (!%p3147_p4)
}
0x1731   :  { %s3151_s5 = scalar_lea.hbm %s3781_s20, 256 }
0x1732   :  { %p3152_p5 = scmp.ne.s32.totalorder %s3781_s20, %s3151_s5  ;;  %p3155_p6 = scmp.lt.u32.totalorder %s3151_s5, %s3781_s20 }
0x1734   :  { %p3157_p7 = pnand %p3155_p6, %p3152_p5 }
0x1736   :  { %3160 = shalt.err (!%p3157_p7)
}
0x1737   :  { %s3197_s25 = smov 128   ;;  %s3198_s6 = smov 8   ;;  %v2688_v17 = vld [vmem:[%s3780_s19] ss:$0 sm:$0xff]  ;;  %vm2566_vm6 = vcmask 254976  }
0x1738   :  { %2579 = dma.vmem_to_hbm [thread:$0]  %s2574_s4, 256, %s3781_s20, [#allocation3], %s3197_s25, %s3197_s25, %s3198_s6  }
0x1739   :  { %s3199_s15 = smov [#allocation4]  }
0x173a   :  { %s2586_s0 = sshll.u32 %s3199_s15, 4  ;;  %s2587_s0 = int_to_ptr.vmem [resolvable:$true] %s2586_s0 }
0x173b   :  { %s3161_s7 = scalar_lea.vmem %s2587_s0, 32  ;;  %p3166_p9 = scmp.lt.s32.totalorder %s2587_s0, %s2587_s0 }
0x173c   :  { %p3162_p8 = scmp.ne.s32.totalorder %s2587_s0, %s3161_s7  ;;  %p3167_p10 = scmp.lt.s32.totalorder %s3161_s7, %s3161_s7 }
0x173e   :  { %p3168_p11 = por %p3167_p10, %p3166_p9 }
0x1740   :  { %p3169_p12 = pnand %p3168_p11, %p3162_p8 }
0x1802   :  { %v2561_v18 = vpop.f32.mrb[28].mxu1 }
0x1803   :  { %v2562_v19 = vadd.f32 %v2688_v17, %v2561_v18  ;;  %v2977_v20 = vpop.f32.mrb[29].mxu1 }
0x1805   :  { %3137 = vtanh.f32 %v2562_v19 }
0x180f   :  { %v3138_v21 = vpop.eup %3137 }
0x1810   :  { %2567 = vst.msk [vmem:[#allocation4] sm:$0x3] %vm2566_vm6, %v3138_v21 }
0x1811   :  { %3172 = shalt.err (!%p3169_p12)
}
0x1812   :  { %s3173_s19 = scalar_lea.hbm %s3782_s21, 32 }
0x1813   :  { %p3174_p13 = scmp.ne.s32.totalorder %s3782_s21, %s3173_s19  ;;  %p3177_p0 = scmp.lt.u32.totalorder %s3173_s19, %s3782_s21 }
0x1815   :  { %p3179_p1 = pnand %p3177_p0, %p3174_p13 }
0x1817   :  { %3182 = shalt.err (!%p3179_p1)
}
0x1818   :  { %2589 = dma.vmem_to_hbm [thread:$0]  %s2587_s0, 32, %s3782_s21, [#allocation5]  }
0x1819   :  { %3183 = dma.done.wait [#allocation3], 256  }
0x181a   :  { %3184 = vsyncadd [#allocation3], 4294967040 }
0x181b   :  { %3185 = dma.done.wait [#allocation5], 32  }
0x181c   :  { %3186 = vsyncadd [#allocation5], 4294967264 }
0x181d   :  { %2596 = vsyncpa [#allocation3], 1 }
0x181e   :  { %2597 = vsyncpa [#allocation5], 1 }

</bundles_post_ra>
